<compile_context>
chip_gen: v6e
topology: v6e:2x2x1
jax: 0.10.0
libtpu: 0.0.40
codegen_flags: <defaults>
</compile_context>

<pallas_src>
import functools

import jax
import jax.numpy as jnp
from jax import lax
from jax.experimental import pallas as pl
from jax.experimental.pallas import tpu as pltpu


# ------------------------------ fused kernel --------------------------------

def _transformer_kernel(
    x_ref, lw_ref, lb_ref,                      # input + initial Linear
    ln1_g_ref, ln1_b_ref,                       # MHA pre-LN
    qkv_w_ref, qkv_b_ref,                       # fused ReLU Q/K/V pre-proj
    in_w_ref, in_b_ref,                         # MHA in_proj (block-diag, scale folded)
    out_w_ref, out_b_ref,                       # MHA out_proj
    ln2_g_ref, ln2_b_ref,                       # FFN pre-LN
    fc1_w_ref, fc1_b_ref, fc2_w_ref, fc2_b_ref, # FFN
    o_ref,                                      # output / carried activation
    qkv_s, attn_s,                              # VMEM scratch
    *, L, N, H, Dh, E, eps=1e-5):

    # Initial Linear(in_dim -> E) only at the first block; o_ref acts as the
    # VMEM-resident carry for "inputs" across the block grid axis.
    @pl.when(pl.program_id(0) == 0)
    def _():
        o_ref[...] = (jnp.dot(x_ref[...], lw_ref[...],
                              preferred_element_type=jnp.float32) + lb_ref[...])

    inputs = o_ref[...]                                            # (M, E) f32

    def layernorm(x, g, b):
        m = jnp.mean(x, axis=-1, keepdims=True)
        xc = x - m
        v = jnp.mean(xc * xc, axis=-1, keepdims=True)              # biased var (torch LN)
        return xc * lax.rsqrt(v + eps) * g + b

    # ---------------- MultiHeadAttention sub-block (pre-LN) -----------------
    q0 = layernorm(inputs, ln1_g_ref[...], ln1_b_ref[...])
    # Fused ReLU(Q/K/V pre-projections): (M, 3E) = [q | k | v]
    qkv = jnp.maximum(
        jnp.dot(q0, qkv_w_ref[...], preferred_element_type=jnp.float32)
        + qkv_b_ref[...], 0.0)
    # nn.MultiheadAttention in_proj as one block-diagonal matmul; the
    # 1/sqrt(Dh) scale is already folded into the q columns of in_w / in_b.
    qkv_s[...] = (jnp.dot(qkv, in_w_ref[...],
                          preferred_element_type=jnp.float32) + in_b_ref[...])

    # Per-(batch, head) attention on VMEM-resident tiles. Rows are batch-major
    # (row = n*L + l), heads are contiguous Dh-wide column chunks, so every
    # tile is a plain static slice -- no transposes / relayouts needed.
    for n in range(N):
        r = n * L
        for h in range(H):
            c = h * Dh
            q_g = qkv_s[r:r + L, c:c + Dh]
            k_g = qkv_s[r:r + L, E + c:E + c + Dh]
            v_g = qkv_s[r:r + L, 2 * E + c:2 * E + c + Dh]
            # q @ k^T without materializing a transpose (contract last dims).
            s = lax.dot_general(q_g, k_g, (((1,), (1,)), ((), ())),
                                preferred_element_type=jnp.float32)
            s = s - jnp.max(s, axis=-1, keepdims=True)
            p = jnp.exp(s)
            p = p * pl.reciprocal(jnp.sum(p, axis=-1, keepdims=True), approx=True)
            attn_s[r:r + L, c:c + Dh] = jnp.dot(
                p, v_g, preferred_element_type=jnp.float32)

    a = (jnp.dot(attn_s[...], out_w_ref[...],
                 preferred_element_type=jnp.float32) + out_b_ref[...])
    mha_out = a + inputs                                           # MHA residual

    # --------------------- FeedForward sub-block (pre-LN) -------------------
    f0 = layernorm(mha_out, ln2_g_ref[...], ln2_b_ref[...])
    f1 = jnp.maximum(
        jnp.dot(f0, fc1_w_ref[...], preferred_element_type=jnp.float32)
        + fc1_b_ref[...], 0.0)
    f2 = (jnp.dot(f1, fc2_w_ref[...], preferred_element_type=jnp.float32)
          + fc2_b_ref[...])
    ffn_out = f2 + mha_out                                         # FFN residual

    o_ref[...] = inputs + ffn_out                                  # outer residual


# ------------------------------ model forward -------------------------------

def transformer_layer_forward(query, packed, *, num_heads):
    """query: (L, N, in_dim) -> (L, N, E)."""
    L, N, Din = query.shape
    E = packed["linear_w"].shape[1]
    BLOCKS = packed["qkv_w"].shape[0]
    DFF = packed["fc1_w"].shape[2]
    H = num_heads
    Dh = E // H
    M = N * L                                  # batch-major rows: row = n*L + l

    x = query.transpose(1, 0, 2).reshape(M, Din)

    kernel = functools.partial(_transformer_kernel, L=L, N=N, H=H, Dh=Dh, E=E)

    per_block = lambda d1, d2: pl.BlockSpec((None, d1, d2), lambda i: (i, 0, 0))
    shared = lambda d1, d2: pl.BlockSpec((d1, d2), lambda i: (0, 0))

    out = pl.pallas_call(
        kernel,
        out_shape=jax.ShapeDtypeStruct((M, E), jnp.float32),
        grid_spec=pltpu.PrefetchScalarGridSpec(
            num_scalar_prefetch=0,
            grid=(BLOCKS,),
            in_specs=[
                shared(M, Din),                # x
                shared(Din, E),                # linear_w
                shared(1, E),                  # linear_b
                per_block(1, E),               # ln1_g
                per_block(1, E),               # ln1_b
                per_block(E, 3 * E),           # qkv_w
                per_block(1, 3 * E),           # qkv_b
                per_block(3 * E, 3 * E),       # in_w (block-diagonal)
                per_block(1, 3 * E),           # in_b
                per_block(E, E),               # out_w
                per_block(1, E),               # out_b
                per_block(1, E),               # ln2_g
                per_block(1, E),               # ln2_b
                per_block(E, DFF),             # fc1_w
                per_block(1, DFF),             # fc1_b
                per_block(DFF, E),             # fc2_w
                per_block(1, E),               # fc2_b
            ],
            out_specs=pl.BlockSpec((M, E), lambda i: (0, 0)),
            scratch_shapes=[
                pltpu.VMEM((M, 3 * E), jnp.float32),   # in_proj output (q'|k'|v')
                pltpu.VMEM((M, E), jnp.float32),       # attention output (heads)
            ],
        ),
        compiler_params=pltpu.CompilerParams(
            dimension_semantics=("arbitrary",)),       # block axis carries state
    )(x,
      packed["linear_w"], packed["linear_b"],
      packed["ln1_g"], packed["ln1_b"],
      packed["qkv_w"], packed["qkv_b"],
      packed["in_w"], packed["in_b"],
      packed["out_w"], packed["out_b"],
      packed["ln2_g"], packed["ln2_b"],
      packed["fc1_w"], packed["fc1_b"],
      packed["fc2_w"], packed["fc2_b"])

    return out.reshape(N, L, E).transpose(1, 0, 2)


# ------------------------------ parameters ----------------------------------

def init_params(key, in_dim, E, dff, block_nums):
    """Weights stored as (in, out), i.e. already transposed from torch (out, in)."""
    def lin(k, din, dout, scale=0.05):
        kw, kb = jax.random.split(k)
        return (jax.random.normal(kw, (din, dout), jnp.float32) * scale,
                jax.random.normal(kb, (dout,), jnp.float32) * scale)

    keys = jax.random.split(key, block_nums + 1)
    lw, lb = lin(keys[0], in_dim, E)
    blocks = []
    for i in range(block_nums):
        bk = jax.random.split(keys[i + 1], 9)
        qw, qb = lin(bk[0], E, E)
        kw_, kb_ = lin(bk[1], E, E)
        vw, vb = lin(bk[2], E, E)
        iqw, iqb = lin(bk[3], E, E)
        ikw, ikb = lin(bk[4], E, E)
        ivw, ivb = lin(bk[5], E, E)
        ow, ob = lin(bk[6], E, E)
        f1w, f1b = lin(bk[7], E, dff)
        f2w, f2b = lin(bk[8], dff, E)
        blocks.append(dict(
            mha_ln_g=jnp.ones((E,), jnp.float32), mha_ln_b=jnp.zeros((E,), jnp.float32),
            qw=qw, qb=qb, kw=kw_, kb=kb_, vw=vw, vb=vb,
            in_qw=iqw, in_qb=iqb, in_kw=ikw, in_kb=ikb, in_vw=ivw, in_vb=ivb,
            out_w=ow, out_b=ob,
            ffn_ln_g=jnp.ones((E,), jnp.float32), ffn_ln_b=jnp.zeros((E,), jnp.float32),
            fc1_w=f1w, fc1_b=f1b, fc2_w=f2w, fc2_b=f2b,
        ))
    return dict(linear_w=lw, linear_b=lb, blocks=blocks)


def pack_params(params, *, num_heads):
    """Pack per-block weights for the fused kernel (stack over blocks,
    concat Q/K/V pre-proj, block-diagonal in_proj with 1/sqrt(Dh) folded in)."""
    E = params["linear_w"].shape[1]
    Dh = E // num_heads
    scale = 1.0 / (Dh ** 0.5)

    def stack(fn):
        return jnp.stack([fn(b) for b in params["blocks"]], axis=0)

    def blockdiag(b):
        w = jnp.zeros((3 * E, 3 * E), jnp.float32)
        w = w.at[:E, :E].set(b["in_qw"] * scale)
        w = w.at[E:2 * E, E:2 * E].set(b["in_kw"])
        w = w.at[2 * E:, 2 * E:].set(b["in_vw"])
        return w

    return dict(
        linear_w=params["linear_w"],
        linear_b=params["linear_b"].reshape(1, E),
        ln1_g=stack(lambda b: b["mha_ln_g"].reshape(1, E)),
        ln1_b=stack(lambda b: b["mha_ln_b"].reshape(1, E)),
        qkv_w=stack(lambda b: jnp.concatenate([b["qw"], b["kw"], b["vw"]], axis=1)),
        qkv_b=stack(lambda b: jnp.concatenate(
            [b["qb"], b["kb"], b["vb"]]).reshape(1, 3 * E)),
        in_w=stack(blockdiag),
        in_b=stack(lambda b: jnp.concatenate(
            [b["in_qb"] * scale, b["in_kb"], b["in_vb"]]).reshape(1, 3 * E)),
        out_w=stack(lambda b: b["out_w"]),
        out_b=stack(lambda b: b["out_b"].reshape(1, E)),
        ln2_g=stack(lambda b: b["ffn_ln_g"].reshape(1, E)),
        ln2_b=stack(lambda b: b["ffn_ln_b"].reshape(1, E)),
        fc1_w=stack(lambda b: b["fc1_w"]),
        fc1_b=stack(lambda b: b["fc1_b"].reshape(1, -1)),
        fc2_w=stack(lambda b: b["fc2_w"]),
        fc2_b=stack(lambda b: b["fc2_b"].reshape(1, E)),
    )


# --------------------------- pure-JAX reference ------------------------------

def reference_forward(query, params, *, num_heads):
    L, N, _ = query.shape
    E = params["linear_w"].shape[1]
    H = num_heads
    Dh = E // H

    def ln(x, g, b, eps=1e-5):
        m = x.mean(-1, keepdims=True)
        v = ((x - m) ** 2).mean(-1, keepdims=True)
        return (x - m) / jnp.sqrt(v + eps) * g + b

    inputs = query @ params["linear_w"] + params["linear_b"]          # (L, N, E)
    for blk in params["blocks"]:
        q0 = ln(inputs, blk["mha_ln_g"], blk["mha_ln_b"])
        q = jax.nn.relu(q0 @ blk["qw"] + blk["qb"])
        k = jax.nn.relu(q0 @ blk["kw"] + blk["kb"])
        v = jax.nn.relu(q0 @ blk["vw"] + blk["vb"])
        qp = q @ blk["in_qw"] + blk["in_qb"]
        kp = k @ blk["in_kw"] + blk["in_kb"]
        vp = v @ blk["in_vw"] + blk["in_vb"]

        def heads(t):                       # (L, N, E) -> (N, H, L, Dh)
            return t.reshape(L, N, H, Dh).transpose(1, 2, 0, 3)

        qh = heads(qp) * (1.0 / (Dh ** 0.5))
        s = jnp.einsum("nhld,nhmd->nhlm", qh, heads(kp))
        p = jax.nn.softmax(s, axis=-1)
        a = jnp.einsum("nhlm,nhmd->nhld", p, heads(vp))
        a = a.transpose(2, 0, 1, 3).reshape(L, N, E)
        a = a @ blk["out_w"] + blk["out_b"]
        mha_out = a + inputs
        f0 = ln(mha_out, blk["ffn_ln_g"], blk["ffn_ln_b"])
        f1 = jax.nn.relu(f0 @ blk["fc1_w"] + blk["fc1_b"])
        f2 = f1 @ blk["fc2_w"] + blk["fc2_b"]
        ffn_out = f2 + mha_out
        inputs = inputs + ffn_out
    return inputs


# ---------------------------------- main -------------------------------------

if __name__ == "__main__":
    # TransformerLayer(out_dim=E, in_dim=16, num_heads=4, attention_size=E=32,
    #                  dim_feedforward=64, block_nums=3); seq L=8, batch N=2.
    L, N, IN_DIM = 8, 2, 16
    E, H, DFF, BLOCKS = 32, 4, 64, 3

    key = jax.random.PRNGKey(0)
    kx, kp = jax.random.split(key)
    query = jax.random.normal(kx, (L, N, IN_DIM), jnp.float32)
    params = init_params(kp, IN_DIM, E, DFF, BLOCKS)
    packed = pack_params(params, num_heads=H)

    out = transformer_layer_forward(query, packed, num_heads=H)
    out = jax.block_until_ready(out)
    assert out.shape == (L, N, E), out.shape
    assert bool(jnp.all(jnp.isfinite(out)))

    ref = reference_forward(query, params, num_heads=H)
    assert jnp.allclose(out, ref, rtol=5e-2, atol=5e-2), \
        float(jnp.max(jnp.abs(out - ref)))

    print("KERNEL_OK")
</pallas_src>

<mosaic_0001>
module attributes {stable_mosaic.version = 11 : i64} {
  func.func @_transformer_kernel(%arg0: i32, %arg1: memref<16x16xf32, #tpu.memory_space<vmem>>, %arg2: memref<16x32xf32, #tpu.memory_space<vmem>>, %arg3: memref<1x32xf32, #tpu.memory_space<vmem>>, %arg4: memref<1x1x32xf32, #tpu.memory_space<vmem>>, %arg5: memref<1x1x32xf32, #tpu.memory_space<vmem>>, %arg6: memref<1x32x96xf32, #tpu.memory_space<vmem>>, %arg7: memref<1x1x96xf32, #tpu.memory_space<vmem>>, %arg8: memref<1x96x96xf32, #tpu.memory_space<vmem>>, %arg9: memref<1x1x96xf32, #tpu.memory_space<vmem>>, %arg10: memref<1x32x32xf32, #tpu.memory_space<vmem>>, %arg11: memref<1x1x32xf32, #tpu.memory_space<vmem>>, %arg12: memref<1x1x32xf32, #tpu.memory_space<vmem>>, %arg13: memref<1x1x32xf32, #tpu.memory_space<vmem>>, %arg14: memref<1x32x64xf32, #tpu.memory_space<vmem>>, %arg15: memref<1x1x64xf32, #tpu.memory_space<vmem>>, %arg16: memref<1x64x32xf32, #tpu.memory_space<vmem>>, %arg17: memref<1x1x32xf32, #tpu.memory_space<vmem>>, %arg18: memref<16x32xf32, #tpu.memory_space<vmem>>, %arg19: memref<16x96xf32, #tpu.memory_space<vmem>>, %arg20: memref<16x32xf32, #tpu.memory_space<vmem>>) attributes {dimension_semantics = [#tpu.dimension_semantics<arbitrary>], iteration_bounds = array<i64: 3>, scalar_prefetch = 0 : i64, scratch_operands = 2 : i64, tpu.core_type = #tpu.core_type<tc>, window_params = [{pipeline_mode = #tpu.pipeline_mode<synchronous>, transform_indices = @transform_0, window_bounds = array<i64: 16, 16>}, {pipeline_mode = #tpu.pipeline_mode<synchronous>, transform_indices = @transform_1, window_bounds = array<i64: 16, 32>}, {pipeline_mode = #tpu.pipeline_mode<synchronous>, transform_indices = @transform_2, window_bounds = array<i64: 1, 32>}, {transform_indices = @transform_3, window_bounds = array<i64: 1, 1, 32>}, {transform_indices = @transform_4, window_bounds = array<i64: 1, 1, 32>}, {transform_indices = @transform_5, window_bounds = array<i64: 1, 32, 96>}, {transform_indices = @transform_6, window_bounds = array<i64: 1, 1, 96>}, {transform_indices = @transform_7, window_bounds = array<i64: 1, 96, 96>}, {transform_indices = @transform_8, window_bounds = array<i64: 1, 1, 96>}, {transform_indices = @transform_9, window_bounds = array<i64: 1, 32, 32>}, {transform_indices = @transform_10, window_bounds = array<i64: 1, 1, 32>}, {transform_indices = @transform_11, window_bounds = array<i64: 1, 1, 32>}, {transform_indices = @transform_12, window_bounds = array<i64: 1, 1, 32>}, {transform_indices = @transform_13, window_bounds = array<i64: 1, 32, 64>}, {transform_indices = @transform_14, window_bounds = array<i64: 1, 1, 64>}, {transform_indices = @transform_15, window_bounds = array<i64: 1, 64, 32>}, {transform_indices = @transform_16, window_bounds = array<i64: 1, 1, 32>}, {pipeline_mode = #tpu.pipeline_mode<synchronous>, transform_indices = @transform_17, window_bounds = array<i64: 16, 32>}]} {
    %c0_i32 = arith.constant 0 : i32
    %0 = arith.cmpi eq, %arg0, %c0_i32 : i32
    %1 = arith.extui %0 : i1 to i32
    %c0_i32_0 = arith.constant 0 : i32
    %2 = arith.cmpi ne, %1, %c0_i32_0 : i32
    scf.if %2 {
      %c0_151 = arith.constant 0 : index
      %c0_152 = arith.constant 0 : index
      %225 = vector.load %arg1[%c0_151, %c0_152] : memref<16x16xf32, #tpu.memory_space<vmem>>, vector<16x16xf32>
      %c0_153 = arith.constant 0 : index
      %c0_154 = arith.constant 0 : index
      %226 = vector.load %arg2[%c0_153, %c0_154] : memref<16x32xf32, #tpu.memory_space<vmem>>, vector<16x32xf32>
      %cst_155 = arith.constant dense<0.000000e+00> : vector<16x32xf32>
      %227 = tpu.matmul %225, %226, %cst_155 {dimension_numbers = #tpu.dot_dimension_numbers<[1], [0], [0], [1], [0, 0, 1, 1], [], []>} : vector<16x16xf32>, vector<16x32xf32>, vector<16x32xf32> -> vector<16x32xf32>
      %c0_156 = arith.constant 0 : index
      %c0_157 = arith.constant 0 : index
      %228 = vector.load %arg3[%c0_156, %c0_157] : memref<1x32xf32, #tpu.memory_space<vmem>>, vector<1x32xf32>
      %229 = vector.broadcast %228 : vector<1x32xf32> to vector<16x32xf32>
      %230 = arith.addf %227, %229 : vector<16x32xf32>
      %c0_158 = arith.constant 0 : index
      %c0_159 = arith.constant 0 : index
      %231 = vector.load %arg18[%c0_158, %c0_159] : memref<16x32xf32, #tpu.memory_space<vmem>>, vector<16x32xf32>
      tpu.vector_store %arg18[%c0_158, %c0_159], %230 {strides = array<i32>} : memref<16x32xf32, #tpu.memory_space<vmem>>, vector<16x32xf32>,
    } else {
    }
    %c0 = arith.constant 0 : index
    %c0_1 = arith.constant 0 : index
    %3 = vector.load %arg18[%c0, %c0_1] : memref<16x32xf32, #tpu.memory_space<vmem>>, vector<16x32xf32>
    %c0_2 = arith.constant 0 : index
    %c0_3 = arith.constant 0 : index
    %c0_4 = arith.constant 0 : index
    %4 = vector.load %arg4[%c0_2, %c0_3, %c0_4] : memref<1x1x32xf32, #tpu.memory_space<vmem>>, vector<1x1x32xf32>
    %5 = vector.shape_cast %4 : vector<1x1x32xf32> to vector<1x32xf32>
    %c0_5 = arith.constant 0 : index
    %c0_6 = arith.constant 0 : index
    %c0_7 = arith.constant 0 : index
    %6 = vector.load %arg5[%c0_5, %c0_6, %c0_7] : memref<1x1x32xf32, #tpu.memory_space<vmem>>, vector<1x1x32xf32>
    %7 = vector.shape_cast %6 : vector<1x1x32xf32> to vector<1x32xf32>
    %cst = arith.constant dense<0.000000e+00> : vector<16xf32>
    %8 = vector.multi_reduction <add>, %3, %cst [1] : vector<16x32xf32> to vector<16xf32>
    %9 = vector.shape_cast %8 : vector<16xf32> to vector<16x1xf32>
    %cst_8 = arith.constant 3.200000e+01 : f32
    %10 = vector.broadcast %cst_8 : f32 to vector<16x1xf32>
    %11 = arith.divf %9, %10 : vector<16x1xf32>
    %12 = vector.broadcast %11 : vector<16x1xf32> to vector<16x32xf32>
    %13 = arith.subf %3, %12 : vector<16x32xf32>
    %14 = arith.mulf %13, %13 : vector<16x32xf32>
    %cst_9 = arith.constant dense<0.000000e+00> : vector<16xf32>
    %15 = vector.multi_reduction <add>, %14, %cst_9 [1] : vector<16x32xf32> to vector<16xf32>
    %16 = vector.shape_cast %15 : vector<16xf32> to vector<16x1xf32>
    %cst_10 = arith.constant 3.200000e+01 : f32
    %17 = vector.broadcast %cst_10 : f32 to vector<16x1xf32>
    %18 = arith.divf %16, %17 : vector<16x1xf32>
    %cst_11 = arith.constant 9.99999974E-6 : f32
    %19 = vector.broadcast %cst_11 : f32 to vector<16x1xf32>
    %20 = arith.addf %18, %19 : vector<16x1xf32>
    %21 = math.rsqrt %20 : vector<16x1xf32>
    %22 = vector.broadcast %21 : vector<16x1xf32> to vector<16x32xf32>
    %23 = arith.mulf %13, %22 : vector<16x32xf32>
    %24 = vector.broadcast %5 : vector<1x32xf32> to vector<16x32xf32>
    %25 = arith.mulf %23, %24 : vector<16x32xf32>
    %26 = vector.broadcast %7 : vector<1x32xf32> to vector<16x32xf32>
    %27 = arith.addf %25, %26 : vector<16x32xf32>
    %c0_12 = arith.constant 0 : index
    %c0_13 = arith.constant 0 : index
    %c0_14 = arith.constant 0 : index
    %28 = vector.load %arg6[%c0_12, %c0_13, %c0_14] : memref<1x32x96xf32, #tpu.memory_space<vmem>>, vector<1x32x96xf32>
    %29 = vector.shape_cast %28 : vector<1x32x96xf32> to vector<32x96xf32>
    %cst_15 = arith.constant dense<0.000000e+00> : vector<16x96xf32>
    %30 = tpu.matmul %27, %29, %cst_15 {dimension_numbers = #tpu.dot_dimension_numbers<[1], [0], [0], [1], [0, 0, 1, 1], [], []>} : vector<16x32xf32>, vector<32x96xf32>, vector<16x96xf32> -> vector<16x96xf32>
    %c0_16 = arith.constant 0 : index
    %c0_17 = arith.constant 0 : index
    %c0_18 = arith.constant 0 : index
    %31 = vector.load %arg7[%c0_16, %c0_17, %c0_18] : memref<1x1x96xf32, #tpu.memory_space<vmem>>, vector<1x1x96xf32>
    %32 = vector.shape_cast %31 : vector<1x1x96xf32> to vector<1x96xf32>
    %33 = vector.broadcast %32 : vector<1x96xf32> to vector<16x96xf32>
    %34 = arith.addf %30, %33 : vector<16x96xf32>
    %cst_19 = arith.constant 0.000000e+00 : f32
    %35 = vector.broadcast %cst_19 : f32 to vector<16x96xf32>
    %36 = arith.maximumf %34, %35 : vector<16x96xf32>
    %c0_20 = arith.constant 0 : index
    %c0_21 = arith.constant 0 : index
    %c0_22 = arith.constant 0 : index
    %37 = vector.load %arg8[%c0_20, %c0_21, %c0_22] : memref<1x96x96xf32, #tpu.memory_space<vmem>>, vector<1x96x96xf32>
    %38 = vector.shape_cast %37 : vector<1x96x96xf32> to vector<96x96xf32>
    %cst_23 = arith.constant dense<0.000000e+00> : vector<16x96xf32>
    %39 = tpu.matmul %36, %38, %cst_23 {dimension_numbers = #tpu.dot_dimension_numbers<[1], [0], [0], [1], [0, 0, 1, 1], [], []>} : vector<16x96xf32>, vector<96x96xf32>, vector<16x96xf32> -> vector<16x96xf32>
    %c0_24 = arith.constant 0 : index
    %c0_25 = arith.constant 0 : index
    %c0_26 = arith.constant 0 : index
    %40 = vector.load %arg9[%c0_24, %c0_25, %c0_26] : memref<1x1x96xf32, #tpu.memory_space<vmem>>, vector<1x1x96xf32>
    %41 = vector.shape_cast %40 : vector<1x1x96xf32> to vector<1x96xf32>
    %42 = vector.broadcast %41 : vector<1x96xf32> to vector<16x96xf32>
    %43 = arith.addf %39, %42 : vector<16x96xf32>
    %c0_27 = arith.constant 0 : index
    %c0_28 = arith.constant 0 : index
    %44 = vector.load %arg19[%c0_27, %c0_28] : memref<16x96xf32, #tpu.memory_space<vmem>>, vector<16x96xf32>
    tpu.vector_store %arg19[%c0_27, %c0_28], %43 {strides = array<i32>} : memref<16x96xf32, #tpu.memory_space<vmem>>, vector<16x96xf32>,
    %c0_29 = arith.constant 0 : index
    %c0_30 = arith.constant 0 : index
    %45 = vector.load %arg19[%c0_29, %c0_30] : memref<16x96xf32, #tpu.memory_space<vmem>>, vector<8x8xf32>
    %c0_31 = arith.constant 0 : index
    %c32 = arith.constant 32 : index
    %46 = vector.load %arg19[%c0_31, %c32] : memref<16x96xf32, #tpu.memory_space<vmem>>, vector<8x8xf32>
    %c0_32 = arith.constant 0 : index
    %c64 = arith.constant 64 : index
    %47 = vector.load %arg19[%c0_32, %c64] : memref<16x96xf32, #tpu.memory_space<vmem>>, vector<8x8xf32>
    %cst_33 = arith.constant dense<0.000000e+00> : vector<8x8xf32>
    %48 = tpu.matmul %45, %46, %cst_33 {dimension_numbers = #tpu.dot_dimension_numbers<[1], [1], [0], [0], [0, 0, 1, 0], [], []>} : vector<8x8xf32>, vector<8x8xf32>, vector<8x8xf32> -> vector<8x8xf32>
    %cst_34 = arith.constant dense<0xFF800000> : vector<8xf32>
    %49 = vector.multi_reduction <maximumf>, %48, %cst_34 [1] : vector<8x8xf32> to vector<8xf32>
    %50 = vector.shape_cast %49 : vector<8xf32> to vector<8x1xf32>
    %51 = vector.broadcast %50 : vector<8x1xf32> to vector<8x8xf32>
    %52 = arith.subf %48, %51 : vector<8x8xf32>
    %53 = math.exp %52 : vector<8x8xf32>
    %cst_35 = arith.constant dense<0.000000e+00> : vector<8xf32>
    %54 = vector.multi_reduction <add>, %53, %cst_35 [1] : vector<8x8xf32> to vector<8xf32>
    %55 = vector.shape_cast %54 : vector<8xf32> to vector<8x1xf32>
    %56 = tpu.reciprocal %55 {approx = true} : vector<8x1xf32> -> vector<8x1xf32>
    %57 = vector.broadcast %56 : vector<8x1xf32> to vector<8x8xf32>
    %58 = arith.mulf %53, %57 : vector<8x8xf32>
    %cst_36 = arith.constant dense<0.000000e+00> : vector<8x8xf32>
    %59 = tpu.matmul %58, %47, %cst_36 {dimension_numbers = #tpu.dot_dimension_numbers<[1], [0], [0], [1], [0, 0, 1, 1], [], []>} : vector<8x8xf32>, vector<8x8xf32>, vector<8x8xf32> -> vector<8x8xf32>
    %c0_37 = arith.constant 0 : index
    %c0_38 = arith.constant 0 : index
    %60 = vector.load %arg20[%c0_37, %c0_38] : memref<16x32xf32, #tpu.memory_space<vmem>>, vector<8x8xf32>
    tpu.vector_store %arg20[%c0_37, %c0_38], %59 {strides = array<i32>} : memref<16x32xf32, #tpu.memory_space<vmem>>, vector<8x8xf32>,
    %c0_39 = arith.constant 0 : index
    %c8 = arith.constant 8 : index
    %61 = vector.load %arg19[%c0_39, %c8] : memref<16x96xf32, #tpu.memory_space<vmem>>, vector<8x8xf32>
    %c0_40 = arith.constant 0 : index
    %c40 = arith.constant 40 : index
    %62 = vector.load %arg19[%c0_40, %c40] : memref<16x96xf32, #tpu.memory_space<vmem>>, vector<8x8xf32>
    %c0_41 = arith.constant 0 : index
    %c72 = arith.constant 72 : index
    %63 = vector.load %arg19[%c0_41, %c72] : memref<16x96xf32, #tpu.memory_space<vmem>>, vector<8x8xf32>
    %cst_42 = arith.constant dense<0.000000e+00> : vector<8x8xf32>
    %64 = tpu.matmul %61, %62, %cst_42 {dimension_numbers = #tpu.dot_dimension_numbers<[1], [1], [0], [0], [0, 0, 1, 0], [], []>} : vector<8x8xf32>, vector<8x8xf32>, vector<8x8xf32> -> vector<8x8xf32>
    %cst_43 = arith.constant dense<0xFF800000> : vector<8xf32>
    %65 = vector.multi_reduction <maximumf>, %64, %cst_43 [1] : vector<8x8xf32> to vector<8xf32>
    %66 = vector.shape_cast %65 : vector<8xf32> to vector<8x1xf32>
    %67 = vector.broadcast %66 : vector<8x1xf32> to vector<8x8xf32>
    %68 = arith.subf %64, %67 : vector<8x8xf32>
    %69 = math.exp %68 : vector<8x8xf32>
    %cst_44 = arith.constant dense<0.000000e+00> : vector<8xf32>
    %70 = vector.multi_reduction <add>, %69, %cst_44 [1] : vector<8x8xf32> to vector<8xf32>
    %71 = vector.shape_cast %70 : vector<8xf32> to vector<8x1xf32>
    %72 = tpu.reciprocal %71 {approx = true} : vector<8x1xf32> -> vector<8x1xf32>
    %73 = vector.broadcast %72 : vector<8x1xf32> to vector<8x8xf32>
    %74 = arith.mulf %69, %73 : vector<8x8xf32>
    %cst_45 = arith.constant dense<0.000000e+00> : vector<8x8xf32>
    %75 = tpu.matmul %74, %63, %cst_45 {dimension_numbers = #tpu.dot_dimension_numbers<[1], [0], [0], [1], [0, 0, 1, 1], [], []>} : vector<8x8xf32>, vector<8x8xf32>, vector<8x8xf32> -> vector<8x8xf32>
    %c0_46 = arith.constant 0 : index
    %c8_47 = arith.constant 8 : index
    %76 = vector.load %arg20[%c0_46, %c8_47] : memref<16x32xf32, #tpu.memory_space<vmem>>, vector<8x8xf32>
    tpu.vector_store %arg20[%c0_46, %c8_47], %75 {strides = array<i32>} : memref<16x32xf32, #tpu.memory_space<vmem>>, vector<8x8xf32>,
    %c0_48 = arith.constant 0 : index
    %c16 = arith.constant 16 : index
    %77 = vector.load %arg19[%c0_48, %c16] : memref<16x96xf32, #tpu.memory_space<vmem>>, vector<8x8xf32>
    %c0_49 = arith.constant 0 : index
    %c48 = arith.constant 48 : index
    %78 = vector.load %arg19[%c0_49, %c48] : memref<16x96xf32, #tpu.memory_space<vmem>>, vector<8x8xf32>
    %c0_50 = arith.constant 0 : index
    %c80 = arith.constant 80 : index
    %79 = vector.load %arg19[%c0_50, %c80] : memref<16x96xf32, #tpu.memory_space<vmem>>, vector<8x8xf32>
    %cst_51 = arith.constant dense<0.000000e+00> : vector<8x8xf32>
    %80 = tpu.matmul %77, %78, %cst_51 {dimension_numbers = #tpu.dot_dimension_numbers<[1], [1], [0], [0], [0, 0, 1, 0], [], []>} : vector<8x8xf32>, vector<8x8xf32>, vector<8x8xf32> -> vector<8x8xf32>
    %cst_52 = arith.constant dense<0xFF800000> : vector<8xf32>
    %81 = vector.multi_reduction <maximumf>, %80, %cst_52 [1] : vector<8x8xf32> to vector<8xf32>
    %82 = vector.shape_cast %81 : vector<8xf32> to vector<8x1xf32>
    %83 = vector.broadcast %82 : vector<8x1xf32> to vector<8x8xf32>
    %84 = arith.subf %80, %83 : vector<8x8xf32>
    %85 = math.exp %84 : vector<8x8xf32>
    %cst_53 = arith.constant dense<0.000000e+00> : vector<8xf32>
    %86 = vector.multi_reduction <add>, %85, %cst_53 [1] : vector<8x8xf32> to vector<8xf32>
    %87 = vector.shape_cast %86 : vector<8xf32> to vector<8x1xf32>
    %88 = tpu.reciprocal %87 {approx = true} : vector<8x1xf32> -> vector<8x1xf32>
    %89 = vector.broadcast %88 : vector<8x1xf32> to vector<8x8xf32>
    %90 = arith.mulf %85, %89 : vector<8x8xf32>
    %cst_54 = arith.constant dense<0.000000e+00> : vector<8x8xf32>
    %91 = tpu.matmul %90, %79, %cst_54 {dimension_numbers = #tpu.dot_dimension_numbers<[1], [0], [0], [1], [0, 0, 1, 1], [], []>} : vector<8x8xf32>, vector<8x8xf32>, vector<8x8xf32> -> vector<8x8xf32>
    %c0_55 = arith.constant 0 : index
    %c16_56 = arith.constant 16 : index
    %92 = vector.load %arg20[%c0_55, %c16_56] : memref<16x32xf32, #tpu.memory_space<vmem>>, vector<8x8xf32>
    tpu.vector_store %arg20[%c0_55, %c16_56], %91 {strides = array<i32>} : memref<16x32xf32, #tpu.memory_space<vmem>>, vector<8x8xf32>,
    %c0_57 = arith.constant 0 : index
    %c24 = arith.constant 24 : index
    %93 = vector.load %arg19[%c0_57, %c24] : memref<16x96xf32, #tpu.memory_space<vmem>>, vector<8x8xf32>
    %c0_58 = arith.constant 0 : index
    %c56 = arith.constant 56 : index
    %94 = vector.load %arg19[%c0_58, %c56] : memref<16x96xf32, #tpu.memory_space<vmem>>, vector<8x8xf32>
    %c0_59 = arith.constant 0 : index
    %c88 = arith.constant 88 : index
    %95 = vector.load %arg19[%c0_59, %c88] : memref<16x96xf32, #tpu.memory_space<vmem>>, vector<8x8xf32>
    %cst_60 = arith.constant dense<0.000000e+00> : vector<8x8xf32>
    %96 = tpu.matmul %93, %94, %cst_60 {dimension_numbers = #tpu.dot_dimension_numbers<[1], [1], [0], [0], [0, 0, 1, 0], [], []>} : vector<8x8xf32>, vector<8x8xf32>, vector<8x8xf32> -> vector<8x8xf32>
    %cst_61 = arith.constant dense<0xFF800000> : vector<8xf32>
    %97 = vector.multi_reduction <maximumf>, %96, %cst_61 [1] : vector<8x8xf32> to vector<8xf32>
    %98 = vector.shape_cast %97 : vector<8xf32> to vector<8x1xf32>
    %99 = vector.broadcast %98 : vector<8x1xf32> to vector<8x8xf32>
    %100 = arith.subf %96, %99 : vector<8x8xf32>
    %101 = math.exp %100 : vector<8x8xf32>
    %cst_62 = arith.constant dense<0.000000e+00> : vector<8xf32>
    %102 = vector.multi_reduction <add>, %101, %cst_62 [1] : vector<8x8xf32> to vector<8xf32>
    %103 = vector.shape_cast %102 : vector<8xf32> to vector<8x1xf32>
    %104 = tpu.reciprocal %103 {approx = true} : vector<8x1xf32> -> vector<8x1xf32>
    %105 = vector.broadcast %104 : vector<8x1xf32> to vector<8x8xf32>
    %106 = arith.mulf %101, %105 : vector<8x8xf32>
    %cst_63 = arith.constant dense<0.000000e+00> : vector<8x8xf32>
    %107 = tpu.matmul %106, %95, %cst_63 {dimension_numbers = #tpu.dot_dimension_numbers<[1], [0], [0], [1], [0, 0, 1, 1], [], []>} : vector<8x8xf32>, vector<8x8xf32>, vector<8x8xf32> -> vector<8x8xf32>
    %c0_64 = arith.constant 0 : index
    %c24_65 = arith.constant 24 : index
    %108 = vector.load %arg20[%c0_64, %c24_65] : memref<16x32xf32, #tpu.memory_space<vmem>>, vector<8x8xf32>
    tpu.vector_store %arg20[%c0_64, %c24_65], %107 {strides = array<i32>} : memref<16x32xf32, #tpu.memory_space<vmem>>, vector<8x8xf32>,
    %c8_66 = arith.constant 8 : index
    %c0_67 = arith.constant 0 : index
    %109 = vector.load %arg19[%c8_66, %c0_67] : memref<16x96xf32, #tpu.memory_space<vmem>>, vector<8x8xf32>
    %c8_68 = arith.constant 8 : index
    %c32_69 = arith.constant 32 : index
    %110 = vector.load %arg19[%c8_68, %c32_69] : memref<16x96xf32, #tpu.memory_space<vmem>>, vector<8x8xf32>
    %c8_70 = arith.constant 8 : index
    %c64_71 = arith.constant 64 : index
    %111 = vector.load %arg19[%c8_70, %c64_71] : memref<16x96xf32, #tpu.memory_space<vmem>>, vector<8x8xf32>
    %cst_72 = arith.constant dense<0.000000e+00> : vector<8x8xf32>
    %112 = tpu.matmul %109, %110, %cst_72 {dimension_numbers = #tpu.dot_dimension_numbers<[1], [1], [0], [0], [0, 0, 1, 0], [], []>} : vector<8x8xf32>, vector<8x8xf32>, vector<8x8xf32> -> vector<8x8xf32>
    %cst_73 = arith.constant dense<0xFF800000> : vector<8xf32>
    %113 = vector.multi_reduction <maximumf>, %112, %cst_73 [1] : vector<8x8xf32> to vector<8xf32>
    %114 = vector.shape_cast %113 : vector<8xf32> to vector<8x1xf32>
    %115 = vector.broadcast %114 : vector<8x1xf32> to vector<8x8xf32>
    %116 = arith.subf %112, %115 : vector<8x8xf32>
    %117 = math.exp %116 : vector<8x8xf32>
    %cst_74 = arith.constant dense<0.000000e+00> : vector<8xf32>
    %118 = vector.multi_reduction <add>, %117, %cst_74 [1] : vector<8x8xf32> to vector<8xf32>
    %119 = vector.shape_cast %118 : vector<8xf32> to vector<8x1xf32>
    %120 = tpu.reciprocal %119 {approx = true} : vector<8x1xf32> -> vector<8x1xf32>
    %121 = vector.broadcast %120 : vector<8x1xf32> to vector<8x8xf32>
    %122 = arith.mulf %117, %121 : vector<8x8xf32>
    %cst_75 = arith.constant dense<0.000000e+00> : vector<8x8xf32>
    %123 = tpu.matmul %122, %111, %cst_75 {dimension_numbers = #tpu.dot_dimension_numbers<[1], [0], [0], [1], [0, 0, 1, 1], [], []>} : vector<8x8xf32>, vector<8x8xf32>, vector<8x8xf32> -> vector<8x8xf32>
    %c8_76 = arith.constant 8 : index
    %c0_77 = arith.constant 0 : index
    %124 = vector.load %arg20[%c8_76, %c0_77] : memref<16x32xf32, #tpu.memory_space<vmem>>, vector<8x8xf32>
    tpu.vector_store %arg20[%c8_76, %c0_77], %123 {strides = array<i32>} : memref<16x32xf32, #tpu.memory_space<vmem>>, vector<8x8xf32>,
    %c8_78 = arith.constant 8 : index
    %c8_79 = arith.constant 8 : index
    %125 = vector.load %arg19[%c8_78, %c8_79] : memref<16x96xf32, #tpu.memory_space<vmem>>, vector<8x8xf32>
    %c8_80 = arith.constant 8 : index
    %c40_81 = arith.constant 40 : index
    %126 = vector.load %arg19[%c8_80, %c40_81] : memref<16x96xf32, #tpu.memory_space<vmem>>, vector<8x8xf32>
    %c8_82 = arith.constant 8 : index
    %c72_83 = arith.constant 72 : index
    %127 = vector.load %arg19[%c8_82, %c72_83] : memref<16x96xf32, #tpu.memory_space<vmem>>, vector<8x8xf32>
    %cst_84 = arith.constant dense<0.000000e+00> : vector<8x8xf32>
    %128 = tpu.matmul %125, %126, %cst_84 {dimension_numbers = #tpu.dot_dimension_numbers<[1], [1], [0], [0], [0, 0, 1, 0], [], []>} : vector<8x8xf32>, vector<8x8xf32>, vector<8x8xf32> -> vector<8x8xf32>
    %cst_85 = arith.constant dense<0xFF800000> : vector<8xf32>
    %129 = vector.multi_reduction <maximumf>, %128, %cst_85 [1] : vector<8x8xf32> to vector<8xf32>
    %130 = vector.shape_cast %129 : vector<8xf32> to vector<8x1xf32>
    %131 = vector.broadcast %130 : vector<8x1xf32> to vector<8x8xf32>
    %132 = arith.subf %128, %131 : vector<8x8xf32>
    %133 = math.exp %132 : vector<8x8xf32>
    %cst_86 = arith.constant dense<0.000000e+00> : vector<8xf32>
    %134 = vector.multi_reduction <add>, %133, %cst_86 [1] : vector<8x8xf32> to vector<8xf32>
    %135 = vector.shape_cast %134 : vector<8xf32> to vector<8x1xf32>
    %136 = tpu.reciprocal %135 {approx = true} : vector<8x1xf32> -> vector<8x1xf32>
    %137 = vector.broadcast %136 : vector<8x1xf32> to vector<8x8xf32>
    %138 = arith.mulf %133, %137 : vector<8x8xf32>
    %cst_87 = arith.constant dense<0.000000e+00> : vector<8x8xf32>
    %139 = tpu.matmul %138, %127, %cst_87 {dimension_numbers = #tpu.dot_dimension_numbers<[1], [0], [0], [1], [0, 0, 1, 1], [], []>} : vector<8x8xf32>, vector<8x8xf32>, vector<8x8xf32> -> vector<8x8xf32>
    %c8_88 = arith.constant 8 : index
    %c8_89 = arith.constant 8 : index
    %140 = vector.load %arg20[%c8_88, %c8_89] : memref<16x32xf32, #tpu.memory_space<vmem>>, vector<8x8xf32>
    tpu.vector_store %arg20[%c8_88, %c8_89], %139 {strides = array<i32>} : memref<16x32xf32, #tpu.memory_space<vmem>>, vector<8x8xf32>,
    %c8_90 = arith.constant 8 : index
    %c16_91 = arith.constant 16 : index
    %141 = vector.load %arg19[%c8_90, %c16_91] : memref<16x96xf32, #tpu.memory_space<vmem>>, vector<8x8xf32>
    %c8_92 = arith.constant 8 : index
    %c48_93 = arith.constant 48 : index
    %142 = vector.load %arg19[%c8_92, %c48_93] : memref<16x96xf32, #tpu.memory_space<vmem>>, vector<8x8xf32>
    %c8_94 = arith.constant 8 : index
    %c80_95 = arith.constant 80 : index
    %143 = vector.load %arg19[%c8_94, %c80_95] : memref<16x96xf32, #tpu.memory_space<vmem>>, vector<8x8xf32>
    %cst_96 = arith.constant dense<0.000000e+00> : vector<8x8xf32>
    %144 = tpu.matmul %141, %142, %cst_96 {dimension_numbers = #tpu.dot_dimension_numbers<[1], [1], [0], [0], [0, 0, 1, 0], [], []>} : vector<8x8xf32>, vector<8x8xf32>, vector<8x8xf32> -> vector<8x8xf32>
    %cst_97 = arith.constant dense<0xFF800000> : vector<8xf32>
    %145 = vector.multi_reduction <maximumf>, %144, %cst_97 [1] : vector<8x8xf32> to vector<8xf32>
    %146 = vector.shape_cast %145 : vector<8xf32> to vector<8x1xf32>
    %147 = vector.broadcast %146 : vector<8x1xf32> to vector<8x8xf32>
    %148 = arith.subf %144, %147 : vector<8x8xf32>
    %149 = math.exp %148 : vector<8x8xf32>
    %cst_98 = arith.constant dense<0.000000e+00> : vector<8xf32>
    %150 = vector.multi_reduction <add>, %149, %cst_98 [1] : vector<8x8xf32> to vector<8xf32>
    %151 = vector.shape_cast %150 : vector<8xf32> to vector<8x1xf32>
    %152 = tpu.reciprocal %151 {approx = true} : vector<8x1xf32> -> vector<8x1xf32>
    %153 = vector.broadcast %152 : vector<8x1xf32> to vector<8x8xf32>
    %154 = arith.mulf %149, %153 : vector<8x8xf32>
    %cst_99 = arith.constant dense<0.000000e+00> : vector<8x8xf32>
    %155 = tpu.matmul %154, %143, %cst_99 {dimension_numbers = #tpu.dot_dimension_numbers<[1], [0], [0], [1], [0, 0, 1, 1], [], []>} : vector<8x8xf32>, vector<8x8xf32>, vector<8x8xf32> -> vector<8x8xf32>
    %c8_100 = arith.constant 8 : index
    %c16_101 = arith.constant 16 : index
    %156 = vector.load %arg20[%c8_100, %c16_101] : memref<16x32xf32, #tpu.memory_space<vmem>>, vector<8x8xf32>
    tpu.vector_store %arg20[%c8_100, %c16_101], %155 {strides = array<i32>} : memref<16x32xf32, #tpu.memory_space<vmem>>, vector<8x8xf32>,
    %c8_102 = arith.constant 8 : index
    %c24_103 = arith.constant 24 : index
    %157 = vector.load %arg19[%c8_102, %c24_103] : memref<16x96xf32, #tpu.memory_space<vmem>>, vector<8x8xf32>
    %c8_104 = arith.constant 8 : index
    %c56_105 = arith.constant 56 : index
    %158 = vector.load %arg19[%c8_104, %c56_105] : memref<16x96xf32, #tpu.memory_space<vmem>>, vector<8x8xf32>
    %c8_106 = arith.constant 8 : index
    %c88_107 = arith.constant 88 : index
    %159 = vector.load %arg19[%c8_106, %c88_107] : memref<16x96xf32, #tpu.memory_space<vmem>>, vector<8x8xf32>
    %cst_108 = arith.constant dense<0.000000e+00> : vector<8x8xf32>
    %160 = tpu.matmul %157, %158, %cst_108 {dimension_numbers = #tpu.dot_dimension_numbers<[1], [1], [0], [0], [0, 0, 1, 0], [], []>} : vector<8x8xf32>, vector<8x8xf32>, vector<8x8xf32> -> vector<8x8xf32>
    %cst_109 = arith.constant dense<0xFF800000> : vector<8xf32>
    %161 = vector.multi_reduction <maximumf>, %160, %cst_109 [1] : vector<8x8xf32> to vector<8xf32>
    %162 = vector.shape_cast %161 : vector<8xf32> to vector<8x1xf32>
    %163 = vector.broadcast %162 : vector<8x1xf32> to vector<8x8xf32>
    %164 = arith.subf %160, %163 : vector<8x8xf32>
    %165 = math.exp %164 : vector<8x8xf32>
    %cst_110 = arith.constant dense<0.000000e+00> : vector<8xf32>
    %166 = vector.multi_reduction <add>, %165, %cst_110 [1] : vector<8x8xf32> to vector<8xf32>
    %167 = vector.shape_cast %166 : vector<8xf32> to vector<8x1xf32>
    %168 = tpu.reciprocal %167 {approx = true} : vector<8x1xf32> -> vector<8x1xf32>
    %169 = vector.broadcast %168 : vector<8x1xf32> to vector<8x8xf32>
    %170 = arith.mulf %165, %169 : vector<8x8xf32>
    %cst_111 = arith.constant dense<0.000000e+00> : vector<8x8xf32>
    %171 = tpu.matmul %170, %159, %cst_111 {dimension_numbers = #tpu.dot_dimension_numbers<[1], [0], [0], [1], [0, 0, 1, 1], [], []>} : vector<8x8xf32>, vector<8x8xf32>, vector<8x8xf32> -> vector<8x8xf32>
    %c8_112 = arith.constant 8 : index
    %c24_113 = arith.constant 24 : index
    %172 = vector.load %arg20[%c8_112, %c24_113] : memref<16x32xf32, #tpu.memory_space<vmem>>, vector<8x8xf32>
    tpu.vector_store %arg20[%c8_112, %c24_113], %171 {strides = array<i32>} : memref<16x32xf32, #tpu.memory_space<vmem>>, vector<8x8xf32>,
    %c0_114 = arith.constant 0 : index
    %c0_115 = arith.constant 0 : index
    %173 = vector.load %arg20[%c0_114, %c0_115] : memref<16x32xf32, #tpu.memory_space<vmem>>, vector<16x32xf32>
    %c0_116 = arith.constant 0 : index
    %c0_117 = arith.constant 0 : index
    %c0_118 = arith.constant 0 : index
    %174 = vector.load %arg10[%c0_116, %c0_117, %c0_118] : memref<1x32x32xf32, #tpu.memory_space<vmem>>, vector<1x32x32xf32>
    %175 = vector.shape_cast %174 : vector<1x32x32xf32> to vector<32x32xf32>
    %cst_119 = arith.constant dense<0.000000e+00> : vector<16x32xf32>
    %176 = tpu.matmul %173, %175, %cst_119 {dimension_numbers = #tpu.dot_dimension_numbers<[1], [0], [0], [1], [0, 0, 1, 1], [], []>} : vector<16x32xf32>, vector<32x32xf32>, vector<16x32xf32> -> vector<16x32xf32>
    %c0_120 = arith.constant 0 : index
    %c0_121 = arith.constant 0 : index
    %c0_122 = arith.constant 0 : index
    %177 = vector.load %arg11[%c0_120, %c0_121, %c0_122] : memref<1x1x32xf32, #tpu.memory_space<vmem>>, vector<1x1x32xf32>
    %178 = vector.shape_cast %177 : vector<1x1x32xf32> to vector<1x32xf32>
    %179 = vector.broadcast %178 : vector<1x32xf32> to vector<16x32xf32>
    %180 = arith.addf %176, %179 : vector<16x32xf32>
    %181 = arith.addf %180, %3 : vector<16x32xf32>
    %c0_123 = arith.constant 0 : index
    %c0_124 = arith.constant 0 : index
    %c0_125 = arith.constant 0 : index
    %182 = vector.load %arg12[%c0_123, %c0_124, %c0_125] : memref<1x1x32xf32, #tpu.memory_space<vmem>>, vector<1x1x32xf32>
    %183 = vector.shape_cast %182 : vector<1x1x32xf32> to vector<1x32xf32>
    %c0_126 = arith.constant 0 : index
    %c0_127 = arith.constant 0 : index
    %c0_128 = arith.constant 0 : index
    %184 = vector.load %arg13[%c0_126, %c0_127, %c0_128] : memref<1x1x32xf32, #tpu.memory_space<vmem>>, vector<1x1x32xf32>
    %185 = vector.shape_cast %184 : vector<1x1x32xf32> to vector<1x32xf32>
    %cst_129 = arith.constant dense<0.000000e+00> : vector<16xf32>
    %186 = vector.multi_reduction <add>, %181, %cst_129 [1] : vector<16x32xf32> to vector<16xf32>
    %187 = vector.shape_cast %186 : vector<16xf32> to vector<16x1xf32>
    %cst_130 = arith.constant 3.200000e+01 : f32
    %188 = vector.broadcast %cst_130 : f32 to vector<16x1xf32>
    %189 = arith.divf %187, %188 : vector<16x1xf32>
    %190 = vector.broadcast %189 : vector<16x1xf32> to vector<16x32xf32>
    %191 = arith.subf %181, %190 : vector<16x32xf32>
    %192 = arith.mulf %191, %191 : vector<16x32xf32>
    %cst_131 = arith.constant dense<0.000000e+00> : vector<16xf32>
    %193 = vector.multi_reduction <add>, %192, %cst_131 [1] : vector<16x32xf32> to vector<16xf32>
    %194 = vector.shape_cast %193 : vector<16xf32> to vector<16x1xf32>
    %cst_132 = arith.constant 3.200000e+01 : f32
    %195 = vector.broadcast %cst_132 : f32 to vector<16x1xf32>
    %196 = arith.divf %194, %195 : vector<16x1xf32>
    %cst_133 = arith.constant 9.99999974E-6 : f32
    %197 = vector.broadcast %cst_133 : f32 to vector<16x1xf32>
    %198 = arith.addf %196, %197 : vector<16x1xf32>
    %199 = math.rsqrt %198 : vector<16x1xf32>
    %200 = vector.broadcast %199 : vector<16x1xf32> to vector<16x32xf32>
    %201 = arith.mulf %191, %200 : vector<16x32xf32>
    %202 = vector.broadcast %183 : vector<1x32xf32> to vector<16x32xf32>
    %203 = arith.mulf %201, %202 : vector<16x32xf32>
    %204 = vector.broadcast %185 : vector<1x32xf32> to vector<16x32xf32>
    %205 = arith.addf %203, %204 : vector<16x32xf32>
    %c0_134 = arith.constant 0 : index
    %c0_135 = arith.constant 0 : index
    %c0_136 = arith.constant 0 : index
    %206 = vector.load %arg14[%c0_134, %c0_135, %c0_136] : memref<1x32x64xf32, #tpu.memory_space<vmem>>, vector<1x32x64xf32>
    %207 = vector.shape_cast %206 : vector<1x32x64xf32> to vector<32x64xf32>
    %cst_137 = arith.constant dense<0.000000e+00> : vector<16x64xf32>
    %208 = tpu.matmul %205, %207, %cst_137 {dimension_numbers = #tpu.dot_dimension_numbers<[1], [0], [0], [1], [0, 0, 1, 1], [], []>} : vector<16x32xf32>, vector<32x64xf32>, vector<16x64xf32> -> vector<16x64xf32>
    %c0_138 = arith.constant 0 : index
    %c0_139 = arith.constant 0 : index
    %c0_140 = arith.constant 0 : index
    %209 = vector.load %arg15[%c0_138, %c0_139, %c0_140] : memref<1x1x64xf32, #tpu.memory_space<vmem>>, vector<1x1x64xf32>
    %210 = vector.shape_cast %209 : vector<1x1x64xf32> to vector<1x64xf32>
    %211 = vector.broadcast %210 : vector<1x64xf32> to vector<16x64xf32>
    %212 = arith.addf %208, %211 : vector<16x64xf32>
    %cst_141 = arith.constant 0.000000e+00 : f32
    %213 = vector.broadcast %cst_141 : f32 to vector<16x64xf32>
    %214 = arith.maximumf %212, %213 : vector<16x64xf32>
    %c0_142 = arith.constant 0 : index
    %c0_143 = arith.constant 0 : index
    %c0_144 = arith.constant 0 : index
    %215 = vector.load %arg16[%c0_142, %c0_143, %c0_144] : memref<1x64x32xf32, #tpu.memory_space<vmem>>, vector<1x64x32xf32>
    %216 = vector.shape_cast %215 : vector<1x64x32xf32> to vector<64x32xf32>
    %cst_145 = arith.constant dense<0.000000e+00> : vector<16x32xf32>
    %217 = tpu.matmul %214, %216, %cst_145 {dimension_numbers = #tpu.dot_dimension_numbers<[1], [0], [0], [1], [0, 0, 1, 1], [], []>} : vector<16x64xf32>, vector<64x32xf32>, vector<16x32xf32> -> vector<16x32xf32>
    %c0_146 = arith.constant 0 : index
    %c0_147 = arith.constant 0 : index
    %c0_148 = arith.constant 0 : index
    %218 = vector.load %arg17[%c0_146, %c0_147, %c0_148] : memref<1x1x32xf32, #tpu.memory_space<vmem>>, vector<1x1x32xf32>
    %219 = vector.shape_cast %218 : vector<1x1x32xf32> to vector<1x32xf32>
    %220 = vector.broadcast %219 : vector<1x32xf32> to vector<16x32xf32>
    %221 = arith.addf %217, %220 : vector<16x32xf32>
    %222 = arith.addf %221, %181 : vector<16x32xf32>
    %223 = arith.addf %3, %222 : vector<16x32xf32>
    %c0_149 = arith.constant 0 : index
    %c0_150 = arith.constant 0 : index
    %224 = vector.load %arg18[%c0_149, %c0_150] : memref<16x32xf32, #tpu.memory_space<vmem>>, vector<16x32xf32>
    tpu.vector_store %arg18[%c0_149, %c0_150], %223 {strides = array<i32>} : memref<16x32xf32, #tpu.memory_space<vmem>>, vector<16x32xf32>,
    return
  }
  func.func @transform_0(%arg0: i32) -> (i32, i32) {
    %c0_i32 = arith.constant 0 : i32
    %c0_i32_0 = arith.constant 0 : i32
    %c0_i32_1 = arith.constant 0 : i32
    return %c0_i32, %c0_i32_0 : i32, i32
  }
  func.func @transform_1(%arg0: i32) -> (i32, i32) {
    %c0_i32 = arith.constant 0 : i32
    %c0_i32_0 = arith.constant 0 : i32
    %c0_i32_1 = arith.constant 0 : i32
    return %c0_i32, %c0_i32_0 : i32, i32
  }
  func.func @transform_2(%arg0: i32) -> (i32, i32) {
    %c0_i32 = arith.constant 0 : i32
    %c0_i32_0 = arith.constant 0 : i32
    %c0_i32_1 = arith.constant 0 : i32
    return %c0_i32, %c0_i32_0 : i32, i32
  }
  func.func @transform_3(%arg0: i32) -> (i32, i32, i32) {
    %c0_i32 = arith.constant 0 : i32
    %c0_i32_0 = arith.constant 0 : i32
    %c0_i32_1 = arith.constant 0 : i32
    return %arg0, %c0_i32, %c0_i32_0 : i32, i32, i32
  }
  func.func @transform_4(%arg0: i32) -> (i32, i32, i32) {
    %c0_i32 = arith.constant 0 : i32
    %c0_i32_0 = arith.constant 0 : i32
    %c0_i32_1 = arith.constant 0 : i32
    return %arg0, %c0_i32, %c0_i32_0 : i32, i32, i32
  }
  func.func @transform_5(%arg0: i32) -> (i32, i32, i32) {
    %c0_i32 = arith.constant 0 : i32
    %c0_i32_0 = arith.constant 0 : i32
    %c0_i32_1 = arith.constant 0 : i32
    return %arg0, %c0_i32, %c0_i32_0 : i32, i32, i32
  }
  func.func @transform_6(%arg0: i32) -> (i32, i32, i32) {
    %c0_i32 = arith.constant 0 : i32
    %c0_i32_0 = arith.constant 0 : i32
    %c0_i32_1 = arith.constant 0 : i32
    return %arg0, %c0_i32, %c0_i32_0 : i32, i32, i32
  }
  func.func @transform_7(%arg0: i32) -> (i32, i32, i32) {
    %c0_i32 = arith.constant 0 : i32
    %c0_i32_0 = arith.constant 0 : i32
    %c0_i32_1 = arith.constant 0 : i32
    return %arg0, %c0_i32, %c0_i32_0 : i32, i32, i32
  }
  func.func @transform_8(%arg0: i32) -> (i32, i32, i32) {
    %c0_i32 = arith.constant 0 : i32
    %c0_i32_0 = arith.constant 0 : i32
    %c0_i32_1 = arith.constant 0 : i32
    return %arg0, %c0_i32, %c0_i32_0 : i32, i32, i32
  }
  func.func @transform_9(%arg0: i32) -> (i32, i32, i32) {
    %c0_i32 = arith.constant 0 : i32
    %c0_i32_0 = arith.constant 0 : i32
    %c0_i32_1 = arith.constant 0 : i32
    return %arg0, %c0_i32, %c0_i32_0 : i32, i32, i32
  }
  func.func @transform_10(%arg0: i32) -> (i32, i32, i32) {
    %c0_i32 = arith.constant 0 : i32
    %c0_i32_0 = arith.constant 0 : i32
    %c0_i32_1 = arith.constant 0 : i32
    return %arg0, %c0_i32, %c0_i32_0 : i32, i32, i32
  }
  func.func @transform_11(%arg0: i32) -> (i32, i32, i32) {
    %c0_i32 = arith.constant 0 : i32
    %c0_i32_0 = arith.constant 0 : i32
    %c0_i32_1 = arith.constant 0 : i32
    return %arg0, %c0_i32, %c0_i32_0 : i32, i32, i32
  }
  func.func @transform_12(%arg0: i32) -> (i32, i32, i32) {
    %c0_i32 = arith.constant 0 : i32
    %c0_i32_0 = arith.constant 0 : i32
    %c0_i32_1 = arith.constant 0 : i32
    return %arg0, %c0_i32, %c0_i32_0 : i32, i32, i32
  }
  func.func @transform_13(%arg0: i32) -> (i32, i32, i32) {
    %c0_i32 = arith.constant 0 : i32
    %c0_i32_0 = arith.constant 0 : i32
    %c0_i32_1 = arith.constant 0 : i32
    return %arg0, %c0_i32, %c0_i32_0 : i32, i32, i32
  }
  func.func @transform_14(%arg0: i32) -> (i32, i32, i32) {
    %c0_i32 = arith.constant 0 : i32
    %c0_i32_0 = arith.constant 0 : i32
    %c0_i32_1 = arith.constant 0 : i32
    return %arg0, %c0_i32, %c0_i32_0 : i32, i32, i32
  }
  func.func @transform_15(%arg0: i32) -> (i32, i32, i32) {
    %c0_i32 = arith.constant 0 : i32
    %c0_i32_0 = arith.constant 0 : i32
    %c0_i32_1 = arith.constant 0 : i32
    return %arg0, %c0_i32, %c0_i32_0 : i32, i32, i32
  }
  func.func @transform_16(%arg0: i32) -> (i32, i32, i32) {
    %c0_i32 = arith.constant 0 : i32
    %c0_i32_0 = arith.constant 0 : i32
    %c0_i32_1 = arith.constant 0 : i32
    return %arg0, %c0_i32, %c0_i32_0 : i32, i32, i32
  }
  func.func @transform_17(%arg0: i32) -> (i32, i32) {
    %c0_i32 = arith.constant 0 : i32
    %c0_i32_0 = arith.constant 0 : i32
    %c0_i32_1 = arith.constant 0 : i32
    return %c0_i32, %c0_i32_0 : i32, i32
  }
}

</mosaic_0001>

<bundles_post_ra>
// kernel: tpu_custom_call.1
= control target key start
LH: loop header
LB: loop body
LE: loop exit
PB: predicated region body
PF: predicated region fallthrough
CT: control target
= control target key end

     0   :  { %s4538_s0 = inlined_call_operand.hbm [shape: f32[16,16], index: 0, kind: input, shape index: {}]   ;;  %s4539_s1 = inlined_call_operand.hbm [shape: f32[16,32], index: 1, kind: input, shape index: {}]   ;;  %s4540_s2 = inlined_call_operand.hbm [shape: f32[1,32], index: 2, kind: input, shape index: {}]   ;;  %s4541_s3 = inlined_call_operand.vmem [shape: f32[3,1,32], index: 3, kind: input, shape index: {}]   ;;  %s4542_s4 = inlined_call_operand.vmem [shape: f32[3,1,32], index: 4, kind: input, shape index: {}]   ;;  %s4543_s5 = inlined_call_operand.hbm [shape: f32[3,32,96], index: 5, kind: input, shape index: {}]   ;;  %s4544_s6 = inlined_call_operand.vmem [shape: f32[3,1,96], index: 6, kind: input, shape index: {}]   ;;  %s4545_s7 = inlined_call_operand.vmem [shape: f32[3,96,96], index: 7, kind: input, shape index: {}]   ;;  %s4546_s8 = inlined_call_operand.vmem [shape: f32[3,1,96], index: 8, kind: input, shape index: {}]   ;;  %s4547_s9 = inlined_call_operand.hbm [shape: f32[3,32,32], index: 9, kind: input, shape index: {}]   ;;  %s4548_s10 = inlined_call_operand.vmem [shape: f32[3,1,32], index: 10, kind: input, shape index: {}]   ;;  %s4549_s11 = inlined_call_operand.vmem [shape: f32[3,1,32], index: 11, kind: input, shape index: {}]   ;;  %s4550_s12 = inlined_call_operand.vmem [shape: f32[3,1,32], index: 12, kind: input, shape index: {}]   ;;  %s4551_s13 = inlined_call_operand.hbm [shape: f32[3,32,64], index: 13, kind: input, shape index: {}]   ;;  %s4552_s14 = inlined_call_operand.vmem [shape: f32[3,1,64], index: 14, kind: input, shape index: {}]   ;;  %s4553_s15 = inlined_call_operand.vmem [shape: f32[3,64,32], index: 15, kind: input, shape index: {}]   ;;  %s4554_s16 = inlined_call_operand.vmem [shape: f32[3,1,32], index: 16, kind: input, shape index: {}]   ;;  %s4555_s17 = inlined_call_operand.hbm [shape: f32[16,32], index: 17, kind: output, shape index: {}]  }
   0x1   :  { %4568 = sst [smem:[#allocation25_spill]] %s4538_s0 }
   0x2   :  { %4569 = sst [smem:[#allocation26_spill]] %s4539_s1 }
   0x3   :  { %4570 = sst [smem:[#allocation27_spill]] %s4540_s2 }
   0x4   :  { %4571 = sst [smem:[#allocation28_spill]] %s4543_s5 }
   0x5   :  { %4572 = sst [smem:[#allocation29_spill]] %s4545_s7 }
   0x6   :  { %4573 = sst [smem:[#allocation30_spill]] %s4547_s9 }
   0x7   :  { %4574 = sst [smem:[#allocation31_spill]] %s4548_s10 }
   0x8   :  { %4575 = sst [smem:[#allocation32_spill]] %s4549_s11 }
   0x9   :  { %4576 = sst [smem:[#allocation33_spill]] %s4550_s12 }
   0xa   :  { %4577 = sst [smem:[#allocation34_spill]] %s4551_s13 }
   0xb   :  { %4578 = sst [smem:[#allocation35_spill]] %s4552_s14 }
   0xc   :  { %4579 = sst [smem:[#allocation36_spill]] %s4553_s15 }
   0xd   :  { %4580 = sst [smem:[#allocation37_spill]] %s4554_s16 }
   0xe   :  { %4581 = sst [smem:[#allocation38_spill]] %s4555_s17 }
   0xf   :  { %22 = vsyncpa [#allocation5], 0 }
  0x10   :  { %23 = vsyncpa [#allocation8], 0 }
  0x11   :  { %24 = vsyncpa [#allocation11], 0 }
  0x12   :  { %26 = vsyncpa [#allocation11 + $0x1], 0 }
  0x13   :  { %27 = vsyncpa [#allocation14], 0 }
  0x14   :  { %29 = vsyncpa [#allocation14 + $0x1], 0 }
  0x15   :  { %30 = vsyncpa [#allocation6], 0  ;;  %s3953_s24 = smov 0   ;;  %s3955_s25 = smov 0  }
  0x16   :  { %s3957_s26 = smov 0   ;;  %s3959_s27 = smov 0  }
  0x17 LB: > { %4582 = sst [smem:[#allocation21_spill]] %s3827_s25  ;;  %s3972_s28 = sadd.s32 4294967295, %s3835_s27   ;;  %s3835_s27 = sphi %s3959_s27, %s4629_s27   ;;  %s3831_s26 = sphi %s3957_s26, %s4632_s26   ;;  %s3827_s25 = sphi %s3955_s25, %s4631_s25   ;;  %s3823_s24 = sphi %s3953_s24, %s4630_s24  }
  0x18   : > { %4583 = sst [smem:[#allocation22_spill]] %s3831_s26  ;;  %s3975_s29 = sadd.s32 1, %s3835_s27  }
  0x19   : > { %4584 = sst [smem:[#allocation23_spill]] %s3975_s29  ;;  %s155_s0 = ssub.s32 %s3835_s27, %s3975_s29 }
  0x1a   : > { %s158_s30 = sadd.s32 1, %s3831_s26  ;;  %p156_p0 = scmp.eq.s32.totalorder %s155_s0, 0 }
  0x1b   : > { %p165_p1 = scmp.ne.s32.totalorder %s3831_s26, %s3827_s25  ;;  %p166_p2 = scmp.eq.s32.totalorder %s3835_s27, 0 }
  0x1c   : > { %p171_p3 = scmp.ne.s32.totalorder %s3827_s25, %s3823_s24  ;;  %p4558_p5 = scmp.eq.s32.totalorder %s3972_s28, 0 }
  0x1d   : > { %s3985_s18 = scalar_select %p156_p0, %s3831_s26, %s158_s30  }
  0x1e   : > { %p3987_p4 = por %p166_p2, %p165_p1  ;;  %p3129_p6 = scmp.ge.s32.totalorder %s3835_s27, 1 }
  0x1f   : > { %4585 = sst [smem:[#allocation24_spill]] %s3985_s18  ;;  %p489_p7 = scmp.lt.s32.totalorder %s3835_s27, 4 }
  0x20   : > { %p3996_p8 = por %p4558_p5, %p171_p3  ;;  %s3837_s21 = smov [#allocation7]  }
  0x21   : > { %p4001_p10 = pnand %p3129_p6, %p489_p7  ;;  %s514_s22 = sshll.u32 %s3837_s21, 4  ;;  %s515_s22 = int_to_ptr.vmem [resolvable:$true] %s514_s22 }
  0x22   : > { %s4587_s1 = scalar_select %p3996_p8, 1, 0 }
  0x23   : > { %s4588_s20 = scalar_select %p4001_p10, 1, 0 }
  0x24   : > { %p3475_p11 = pneg %p4001_p10  ;;  %p3498_p13 = scmp.lt.s32.totalorder %s3835_s27, 3 }
  0x25   : > { %s551_s24 = sand.u32 1, %s3835_s27   ;;  %s3610_s30 = scalar_lea.vmem %s515_s22, 256 }
  0x26   : > { %p4009_p12 = pnand %p3475_p11, %p4558_p5  ;;  %p3611_p1 = scmp.ne.s32.totalorder %s515_s22, %s3610_s30 }
  0x27   : > { %p3618_p6 = scmp.lt.s32.totalorder %s515_s22, %s515_s22  ;;  %p3619_p7 = scmp.lt.s32.totalorder %s3610_s30, %s3610_s30 }
  0x28   : > { %s4589_s23 = scalar_select %p4009_p12, 1, 0 }
  0x29   : > { %p4561_p0 = pneg %p4009_p12  ;;  %p3620_p9 = por %p3619_p7, %p3618_p6 }
  0x2b   : > { %p3613_p2 = pnand %p3611_p1, %p4561_p0 }
  0x2d   : > { %p3614_p3 = pneg %p3613_p2 }
  0x2f   : > { %p3621_p11 = pnand %p3620_p9, %p3614_p3 }
  0x31   : > { %3624 = shalt.err (!%p3621_p11)
}
  0x32   : > { %s4559_s21 = smov 128   ;;  %s3839_s0 = smov 8  }
  0x33   : > { %s4590_s17 = sld [smem:[#allocation26_spill]]  ;;  %s4591_s15 = sand.u32 1, %s3831_s26  }
  0x34   : > { %s4031_s30 = sshll.u32 %s4591_s15, 5  ;;  %s4034_s16 = sshll.u32 %s3835_s27, 9 }
  0x35   : > { %s4592_s5 = sld [smem:[#allocation28_spill]]  ;;  %s555_s7 = scalar_lea.vmem [#allocation10], %s4031_s30 }
  0x36   : > { %s562_s10 = sshll.u32 %s555_s7, 4  ;;  %p4047_p9 = pnand %p3498_p13, %p3987_p4  ;;  %s4051_s10 = int_to_ptr.vmem [resolvable:$true] %s562_s10 }
  0x37   : > { %s3840_s15 = smov [#allocation4]   ;;  %s4055_s12 = scalar_lea.sflag [#allocation11], %s551_s24 }
  0x38   : > { %s4053_s29 = sshll.u32 %s3840_s15, 4  ;;  %p4061_p2 = pneg %p4047_p9  ;;  %s502_s29 = int_to_ptr.vmem [resolvable:$true] %s4053_s29 }
  0x39   : > { %3481 = dma.hbm_to_vmem [thread:$0]  (!%p4009_p12), %s4590_s17, 256, %s515_s22, [#allocation8], %s4559_s21, %s4559_s21, %s3839_s0  }
  0x3b   : > { %s4040_s11 = scalar_lea.hbm %s4592_s5, %s4034_s16  ;;  %s3630_s19 = scalar_lea.hbm %s4592_s5, 1536 }
  0x3c   : > { %s3625_s14 = scalar_lea.hbm %s4040_s11, 512  ;;  %p3631_p3 = scmp.lt.s32.totalorder %s4040_s11, %s4592_s5 }
  0x3d   : > { %p3626_p1 = scmp.ne.s32.totalorder %s4040_s11, %s3625_s14  ;;  %p3632_p6 = scmp.lt.s32.totalorder %s3630_s19, %s3625_s14 }
  0x3f   : > { %p3628_p4 = pnand %p4061_p2, %p3626_p1  ;;  %p3633_p7 = por %p3632_p6, %p3631_p3 }
  0x41   : > { %p3629_p13 = pneg %p3628_p4 }
  0x43   : > { %p3634_p11 = pnand %p3633_p7, %p3629_p13 }
  0x45   : > { %3637 = shalt.err (!%p3634_p11)
}
  0x46   : > { %s3638_s24 = scalar_lea.vmem %s4051_s10, 512  ;;  %s3841_s21 = smov [#allocation10]  }
  0x47   : > { %p3639_p5 = scmp.ne.s32.totalorder %s4051_s10, %s3638_s24  ;;  %s3643_s7 = sshll.u32 %s3841_s21, 4  ;;  %s3644_s7 = int_to_ptr.vmem [resolvable:$false] %s3643_s7 }
  0x48   : > { %s3645_s27 = scalar_lea.vmem %s3644_s7, 1024  ;;  %p3646_p0 = scmp.lt.s32.totalorder %s4051_s10, %s3644_s7 }
  0x49   : > { %p3641_p1 = pnand %p3639_p5, %p4061_p2  ;;  %p3647_p8 = scmp.lt.s32.totalorder %s3645_s27, %s3638_s24 }
  0x4b   : > { %p3642_p4 = pneg %p3641_p1  ;;  %p3648_p10 = por %p3647_p8, %p3646_p0 }
  0x4d   : > { %p3649_p12 = pnand %p3648_p10, %p3642_p4 }
  0x4f   : > { %3652 = shalt.err (!%p3649_p12)
}
  0x50   : > { %s4595_s14 = smov 128   ;;  %s3664_s21 = scalar_lea.vmem %s502_s29, 256 }
  0x51   : > { %3488 = dma.hbm_to_vmem [thread:$0]  (!%p4047_p9), %s4040_s11, 512, %s4051_s10, %s4055_s12, %s4595_s14, %s4595_s14, %s3839_s0  }
  0x52   : > { %p3665_p5 = scmp.ne.s32.totalorder %s502_s29, %s3664_s21  ;;  %p4596_p13 = scmp.ne.s32.totalorder %s4589_s23, 0 }
  0x53   : > { %p3672_p10 = scmp.lt.s32.totalorder %s502_s29, %s502_s29  ;;  %p3673_p12 = scmp.lt.s32.totalorder %s3664_s21, %s3664_s21 }
  0x54   : > { %p4597_p3 = pneg %p4596_p13 }
  0x55   : > { %p3674_p0 = por %p3673_p12, %p3672_p10 }
  0x56   : > { %p3667_p6 = pnand %p3665_p5, %p4597_p3 }
  0x58   : > { %p3668_p8 = pneg %p3667_p6 }
  0x5a   : > { %p3675_p7 = pnand %p3674_p0, %p3668_p8 }
  0x5c   : > { %3678 = shalt.err (!%p3675_p7)
}
  0x5d   : > { %s4598_s10 = sld [smem:[#allocation25_spill]]  ;;  %s3842_s11 = smov [#allocation9]  }
  0x5e   : > { %s528_s15 = sshll.u32 %s3842_s11, 4  ;;  %s4599_s9 = sld [smem:[#allocation30_spill]]  ;;  %s529_s15 = int_to_ptr.vmem [resolvable:$true] %s528_s15 }
  0x5f   : > { %s3690_s21 = scalar_lea.vmem %s529_s15, 16  ;;  %p4600_p1 = pmov %p4597_p3 }
  0x60   : > { %p3691_p11 = scmp.ne.s32.totalorder %s529_s15, %s3690_s21  ;;  %s3697_s5 = scalar_lea.vmem %s529_s15, 32 }
  0x61   : > { %p3698_p3 = scmp.lt.s32.totalorder %s529_s15, %s529_s15  ;;  %p3699_p6 = scmp.lt.s32.totalorder %s3697_s5, %s3690_s21 }
  0x62   : > { %p3693_p4 = pnand %p3691_p11, %p4600_p1 }
  0x63   : > { %3478 = dma.hbm_to_vmem [thread:$0]  (!%p4596_p13), %s4598_s10, 256, %s502_s29, [#allocation5], %s4595_s14, %s4595_s14, %s3839_s0  }
  0x64   : > { %s4103_s27 = scalar_lea.hbm %s4599_s9, %s4034_s16  ;;  %p3694_p5 = pneg %p3693_p4 }
  0x65   : > { %p3700_p8 = por %p3699_p6, %p3698_p3 }
  0x67   : > { %p3701_p10 = pnand %p3700_p8, %p3694_p5 }
  0x69   : > { %3704 = shalt.err (!%p3701_p10)
}
  0x6a   : > { %s4601_s2 = sld [smem:[#allocation27_spill]]  ;;  %s596_s22 = scalar_lea.vmem [#allocation12], %s4031_s30 }
  0x6b   : > { %s603_s10 = sshll.u32 %s596_s22, 4  ;;  %s3705_s11 = scalar_lea.hbm %s4103_s27, 512  ;;  %s604_s10 = int_to_ptr.vmem [resolvable:$true] %s603_s10 }
  0x6c   : > { %p3706_p12 = scmp.ne.s32.totalorder %s4103_s27, %s3705_s11  ;;  %s3710_s23 = scalar_lea.hbm %s4599_s9, 1536 }
  0x6d   : > { %p3711_p11 = scmp.lt.s32.totalorder %s4103_s27, %s4599_s9  ;;  %p3712_p1 = scmp.lt.s32.totalorder %s3710_s23, %s3705_s11 }
  0x6e   : > { %p3708_p0 = pnand %p3706_p12, %p4061_p2 }
  0x6f   : > { %p3713_p4 = por %p3712_p1, %p3711_p11 }
  0x70   : > { %3484 = dma.hbm_to_vmem [thread:$0]  (!%p4596_p13), %s4601_s2, 16, %s529_s15, [#allocation8]  }
  0x71   : > { %p3709_p7 = pneg %p3708_p0 }
  0x73   : > { %p3714_p5 = pnand %p3713_p4, %p3709_p7 }
  0x75   : > { %3717 = shalt.err (!%p3714_p5)
}
  0x76   : > { %s3718_s15 = scalar_lea.vmem %s604_s10, 512  ;;  %s3843_s29 = smov [#allocation12]  }
  0x77   : > { %p3719_p13 = scmp.ne.s32.totalorder %s604_s10, %s3718_s15  ;;  %s3723_s19 = sshll.u32 %s3843_s29, 4  ;;  %s3724_s19 = int_to_ptr.vmem [resolvable:$false] %s3723_s19 }
  0x78   : > { %s3725_s22 = scalar_lea.vmem %s3724_s19, 1024  ;;  %p3726_p8 = scmp.lt.s32.totalorder %s604_s10, %s3724_s19 }
  0x79   : > { %p3721_p3 = pnand %p3719_p13, %p4061_p2  ;;  %p3727_p10 = scmp.lt.s32.totalorder %s3725_s22, %s3718_s15 }
  0x7b   : > { %p3722_p6 = pneg %p3721_p3  ;;  %p3728_p12 = por %p3727_p10, %p3726_p8 }
  0x7d   : > { %p3729_p0 = pnand %p3728_p12, %p3722_p6 }
  0x7f   : > { %3732 = shalt.err (!%p3729_p0)
}
  0x80   : > { %3491 = dma.hbm_to_vmem [thread:$0]  (!%p4047_p9), %s4103_s27, 512, %s604_s10, %s4055_s12, %s4595_s14, %s4595_s14, %s3839_s0  }
  0x81   : > { %s4602_s13 = sld [smem:[#allocation34_spill]]  ;;  %s635_s23 = scalar_lea.vmem [#allocation13], %s4031_s30 }
  0x82   : > { %s642_s7 = sshll.u32 %s635_s23, 4  ;;  %s4603_s21 = sand.u32 1, %s3831_s26   ;;  %s4141_s7 = int_to_ptr.vmem [resolvable:$true] %s642_s7 }
  0x83   : > { %s632_s15 = scalar_lea.sflag [#allocation14], %s4603_s21 }
  0x87   : > { %s4138_s24 = scalar_lea.hbm %s4602_s13, %s4034_s16  ;;  %s3738_s10 = scalar_lea.hbm %s4602_s13, 1536 }
  0x88   : > { %s3733_s29 = scalar_lea.hbm %s4138_s24, 512  ;;  %p3739_p4 = scmp.lt.s32.totalorder %s4138_s24, %s4602_s13 }
  0x89   : > { %p3734_p7 = scmp.ne.s32.totalorder %s4138_s24, %s3733_s29  ;;  %p3740_p5 = scmp.lt.s32.totalorder %s3738_s10, %s3733_s29 }
  0x8b   : > { %p3736_p11 = pnand %p3734_p7, %p4061_p2  ;;  %p3741_p13 = por %p3740_p5, %p3739_p4 }
  0x8d   : > { %p3737_p1 = pneg %p3736_p11 }
  0x8f   : > { %p3742_p3 = pnand %p3741_p13, %p3737_p1 }
  0x91   : > { %3745 = shalt.err (!%p3742_p3)
}
  0x92   : > { %s3746_s30 = scalar_lea.vmem %s4141_s7, 512  ;;  %s3844_s22 = smov [#allocation13]  }
  0x93   : > { %p3747_p6 = scmp.ne.s32.totalorder %s4141_s7, %s3746_s30  ;;  %s3751_s11 = sshll.u32 %s3844_s22, 4  ;;  %s3752_s11 = int_to_ptr.vmem [resolvable:$false] %s3751_s11 }
  0x94   : > { %s3753_s5 = scalar_lea.vmem %s3752_s11, 1024  ;;  %p3754_p12 = scmp.lt.s32.totalorder %s4141_s7, %s3752_s11 }
  0x95   : > { %p3749_p8 = pnand %p3747_p6, %p4061_p2  ;;  %p3755_p0 = scmp.lt.s32.totalorder %s3753_s5, %s3746_s30 }
  0x97   : > { %p3750_p10 = pneg %p3749_p8  ;;  %p3756_p7 = por %p3755_p0, %p3754_p12 }
  0x99   : > { %p3757_p11 = pnand %p3756_p7, %p3750_p10 }
  0x9b   : > { %3760 = shalt.err (!%p3757_p11)
}
  0x9c   : > { %3494 = dma.hbm_to_vmem [thread:$0]  (!%p4047_p9), %s4138_s24, 512, %s4141_s7, %s632_s15, %s4595_s14, %s4595_s14, %s3839_s0  }
  0x9d   : > { %p4604_p2 = scmp.ne.s32.totalorder %s4588_s20, 0 }
  0x9e   : > { %p4605_p1 = scmp.eq.s32.totalorder (!%p4604_p2), %s3972_s28, 0 }
  0x9f   : > { %674 = sbr.rel (%p4604_p2) target bundleno = 4061 (0xfdd), region = 88 }
  0xa4   : > { %3802 = dma.done.wait (%p4605_p1), [#allocation5], 256   ;;  %p4606_p4 = pmov %p4605_p1 }
  0xa5   : > { %p4607_p5 = pmov %p4605_p1 }
  0xa6   : > { %3804 = vsyncadd (%p4606_p4), [#allocation5], 4294967040 }
  0xa7   : > { %3806 = dma.done.wait (%p4607_p5), [#allocation8], 272   ;;  %p4608_p13 = pmov %p4605_p1 }
  0xa8   : > { %s688_s17 = sand.u32 1, %s3972_s28   ;;  %s690_s0 = sand.u32 1, %s3827_s25  }
  0xa9   : > { %3808 = vsyncadd (%p4608_p13), [#allocation8], 4294967024  ;;  %s3147_s18 = sshll.u32 %s690_s0, 5  ;;  %s689_s20 = scalar_lea.sflag [#allocation11], %s688_s17 }
  0xaa   : > { %s4180_s14 = scalar_lea.vmem [#allocation10], %s3147_s18  ;;  %p4609_p9 = scmp.ne.s32.totalorder %s4587_s1, 0 }
  0xac   : > { %3810 = dma.done.wait (%p4609_p9), %s689_s20, 1024  }
  0xad   : > { %3812 = vsyncadd (%p4609_p9), %s689_s20, 4294966272  ;;  %s4186_s24 = scalar_lea.vmem [#allocation12], %s3147_s18  ;;  %s707_s23 = scalar_lea.sflag [#allocation14], %s690_s0 }
  0xae   : > { %s4188_s7 = scalar_lea.vmem [#allocation13], %s3147_s18 }
  0xaf   : > { %3814 = dma.done.wait (%p4609_p9), %s707_s23, 512  }
  0xb0   : > { %3816 = vsyncadd (%p4609_p9), %s707_s23, 4294966784  ;;  %p803_p3 = scmp.lt.s32.totalorder %s3972_s28, 2  ;;  %s4611_s1 = sld [smem:[#allocation29_spill]] }
  0xb1   : > { %s4612_s10 = sld [smem:[#allocation32_spill]]  ;;  %p4617_p6 = scmp.ne.s32.totalorder %s3972_s28, 0 }
  0xb2   : > { %s4196_s21 = scalar_select %p803_p3, %s3972_s28, 2 }
  0xb3   : > { %s4613_s30 = sld [smem:[#allocation33_spill]] }
  0xb4   : > { %s3452_s22 = smul.u32 96, %s4196_s21  ;;  %s4614_s5 = sld [smem:[#allocation35_spill]] }
  0xb5   : > { %s3207_s25 = sshll.u32 %s4196_s21, 6  ;;  %s4615_s20 = sld [smem:[#allocation37_spill]] }
  0xb6   : > { %s4222_s2 = scalar_lea.vmem %s4611_s1, %s3452_s22  ;;  %s4616_s22 = sld [smem:[#allocation36_spill]] }
  0xb7   : > { %s825_s9 = scalar_lea.vmem %s4612_s10, %s4196_s21 }
  0xb8   : > { %843 = sbr.rel (%p4617_p6) target bundleno = 392 (0x188), region = 116 }
  0xb9   : > { %s828_s13 = scalar_lea.vmem %s4613_s30, %s4196_s21 }
  0xba   : > { %s831_s17 = scalar_lea.vmem %s4614_s5, %s4196_s21 }
  0xbb   : > { %s839_s23 = scalar_lea.vmem %s4615_s20, %s4196_s21 }
  0xbc   : > { %s4244_s29 = scalar_lea.vmem %s4616_s22, %s3207_s25 }
  0xbd   : > { %v847_v0 = vld [vmem:[#allocation7 + $0x8] sm:$0xff]  ;;  %v846_v1 = vld [vmem:[#allocation7] sm:$0xff]  ;;  %v844_v2 = vld [vmem:[#allocation4] sm:$0xff]  ;;  %vm855_vm0 = vcmask 130048   ;;  %vm937_vm1 = vcmask 261120  }
  0xbe   : > { %3286 = vmatprep.subr.mxu0 %v847_v0  ;;  %3290 = vmatprep.mubr.msk.f32.mxu0 %vm855_vm0, %v844_v2  ;;  %v845_v3 = vld [vmem:[#allocation4 + $0x8] sm:$0xff]  ;;  %v3154_v4 = vld [vmem:[#allocation9] ss:$0 sm:$0xff] }
  0xbf   : > { %3287 = vmatpush3.msra.mxu0 %v847_v0 }
  0xc0   : > { %3288 = vmatprep.subr.mxu0 %v846_v1 }
  0xc1   : > { %3289 = vmatpush3.msra.mxu0 %v846_v1 }
  0xc2   : > { %3291 = vmatmul.mubr.msk.f32.vlgmr.msra.gmra.mxu0 %vm855_vm0, %v845_v3 }
 0x182   : > { %v3292_v5 = vpop.f32.mrf.mxu0 }
 0x183   : > { %v934_v6 = vadd.f32 %v3292_v5, %v3154_v4 }
 0x184   : > { %v928_v7 = vpop.f32.mrf.mxu0 }
 0x185   : > { %939 = vst.msk [vmem:[#allocation15 + $0x8] sm:$0xff] %vm937_vm1, %v934_v6  ;;  %v929_v8 = vadd.f32 %v3154_v4, %v928_v7 }
 0x187   : > { %938 = vst.msk [vmem:[#allocation15] sm:$0xff] %vm937_vm1, %v929_v8 }
 0x188 PF: > { %vm944_vm2 = vcmask 261120   ;;  %v991_v23 = vld [vmem:[%s4180_s14 + $0x18] sm:$0xff]  ;;  %v990_v24 = vld [vmem:[%s4180_s14 + $0x10] sm:$0xff]  ;;  %v989_v25 = vld [vmem:[%s4180_s14 + $0x8] sm:$0xff]  ;;  %s4619_s12 = scalar_lea.vmem %s4542_s4, %s4196_s21  ;;  %s4620_s19 = scalar_lea.vmem %s4544_s6, %s4196_s21  ;;  %vm1101_vm3 = vcmask 785408   ;;  %v3845_v62 = vmov 0.0  }
 0x189   : > { %3293 = vmatprep.subr.mxu1 %v991_v23  ;;  %v988_v26 = vld [vmem:[%s4180_s14] sm:$0xff]  ;;  %v1093_v27 = vld [vmem:[%s4222_s2 + $0x58] sm:$0xff]  ;;  %s4618_s14 = scalar_lea.vmem %s4541_s3, %s4196_s21  ;;  %v3158_v37 = vld [vmem:[%s4619_s12] ss:$0 sm:$0xff]  ;;  %3331 = vmatprep.subr.mxu0 %v3845_v62  ;;  %s4621_s5 = scalar_lea.vmem %s4546_s8, %s4196_s21  ;;  %vm3846_vm4 = vmmov 0   ;;  %vm1189_vm5 = vcmask 64512  }
 0x18a   : > { %3294 = vmatpush3.msra.mxu1 %v991_v23  ;;  %v3157_v35 = vld [vmem:[%s4618_s14] ss:$0 sm:$0xff]  ;;  %v1092_v44 = vld [vmem:[%s4222_s2 + $0x50] sm:$0xff]  ;;  %v1091_v45 = vld [vmem:[%s4222_s2 + $0x48] sm:$0xff]  ;;  %3333 = vmatprep.mubr.msk.f32.mxu0 %vm3846_vm4, %v3845_v62  ;;  %s3847_s0 = smov 96   ;;  %s3848_s18 = smov 88  }
 0x18b   : > { %3295 = vmatprep.subr.mxu1 %v990_v24  ;;  %v1090_v46 = vld [vmem:[%s4222_s2 + $0x40] sm:$0xff]  ;;  %v1089_v47 = vld [vmem:[%s4222_s2 + $0x38] sm:$0xff]  ;;  %v1088_v48 = vld [vmem:[%s4222_s2 + $0x30] sm:$0xff]  ;;  %s3849_s20 = smov 64   ;;  %s3850_s15 = smov 120   ;;  %vm1523_vm6 = vcmask 130112  }
 0x18c   : > { %v4250_v10 = vld [vmem:[#allocation15 + $0x8] sm:$0xff]  ;;  %3296 = vmatpush3.msra.mxu1 %v990_v24  ;;  %v1086_v50 = vld [vmem:[%s4222_s2 + $0x20] sm:$0xff]  ;;  %v1085_v51 = vld [vmem:[%s4222_s2 + $0x18] sm:$0xff]  ;;  %s3851_s1 = smov 80   ;;  %s3852_s22 = smov 56   ;;  %vm1696_vm7 = vcmask 195712  }
 0x18d   : > { %v948_v12 = vsel %vm944_vm2, %v4250_v10, 0.0  ;;  %3297 = vmatprep.subr.mxu1 %v989_v25  ;;  %v1087_v49 = vld [vmem:[%s4222_s2 + $0x28] sm:$0xff]  ;;  %v1084_v52 = vld [vmem:[%s4222_s2 + $0x10] sm:$0xff]  ;;  %v1082_v54 = vld [vmem:[%s4222_s2] sm:$0xff]  ;;  %s3853_s25 = smov 112   ;;  %s3854_s26 = smov 104  }
 0x18e   : > { %v4248_v9 = vld [vmem:[#allocation15] sm:$0xff]  ;;  %3298 = vmatpush3.msra.mxu1 %v989_v25  ;;  %v3159_v55 = vld [vmem:[%s4620_s19] ss:$0 sm:$0xff]  ;;  %s3855_s14 = smov 72   ;;  %s3856_s10 = smov 40   ;;  %vm1869_vm8 = vcmask 261312  }
 0x18f   : > { %v945_v11 = vsel %vm944_vm2, %v4248_v9, 0.0  ;;  %3299 = vmatprep.subr.mxu1 %v988_v26  ;;  %v1083_v53 = vld [vmem:[%s4222_s2 + $0x8] sm:$0xff]  ;;  %v3162_v63 = vld [vmem:[%s4621_s5] ss:$0 sm:$0xff]  ;;  %s3857_s30 = smov 48   ;;  %s3858_s12 = smov 8  }
 0x190   : > { %946 = vadd.xlane.f32.xlu0 %v945_v11  ;;  %3300 = vmatpush3.msra.mxu1 %v988_v26  ;;  %s3859_s27 = smov 16   ;;  %s3860_s16 = smov 24   ;;  %vm2802_vm9 = vcmask 523264  }
 0x191   : > { %3304 = vmatprep.subr.mxu1 %v1093_v27  ;;  %s4622_s2 = sld [smem:[#allocation31_spill]]  ;;  %p3502_p8 = scmp.eq.s32.totalorder %s3972_s28, 2 }
 0x194   : > { %949 = vadd.xlane.f32.xlu0 %v948_v12 }
 0x197   : > { %s4623_s11 = scalar_lea.vmem %s4622_s2, %s4196_s21 }
 0x219   : > { %v947_v13 = vpop.xlane.xlu0 %946 }
 0x21a   : > { %v952_v14 = vmul.f32 0.03125, %v947_v13 }
 0x21c   : > { %v954_v15 = vsub.f32 %v4248_v9, %v952_v14 }
 0x21d   : > { %v950_v16 = vpop.xlane.xlu0 %949 }
 0x21e   : > { %v953_v17 = vmul.f32 0.03125, %v950_v16  ;;  %v956_v18 = vmul.f32 %v954_v15, %v954_v15 }
 0x220   : > { %v955_v19 = vsub.f32 %v4250_v10, %v953_v17  ;;  %v958_v20 = vsel %vm944_vm2, %v956_v18, 0.0 }
 0x221   : > { %959 = vadd.xlane.f32.xlu1 %v958_v20 }
 0x222   : > { %v957_v21 = vmul.f32 %v955_v19, %v955_v19 }
 0x224   : > { %v961_v22 = vsel %vm944_vm2, %v957_v21, 0.0 }
 0x225   : > { %962 = vadd.xlane.f32.xlu1 %v961_v22 }
 0x2aa   : > { %v960_v28 = vpop.xlane.xlu1 %959 }
 0x2ab   : > { %v964_v29 = vmul.f32 0.03125, %v960_v28 }
 0x2ad   : > { %v966_v30 = vadd.f32 1e-05, %v964_v29 }
 0x2ae   : > { %v963_v31 = vpop.xlane.xlu1 %962 }
 0x2af   : > { %3559 = vrsqrt.f32 %v966_v30  ;;  %v965_v32 = vmul.f32 0.03125, %v963_v31 }
 0x2b1   : > { %v967_v33 = vadd.f32 1e-05, %v965_v32 }
 0x2b3   : > { %3561 = vrsqrt.f32 %v967_v33 }
 0x2bc   : > { %v3560_v34 = vpop.eup %3559 }
 0x2bd   : > { %v970_v36 = vmul.f32 %v3560_v34, %v954_v15 }
 0x2bf   : > { %v978_v38 = vmul.f32 %v3157_v35, %v970_v36 }
 0x2c0   : > { %v3562_v39 = vpop.eup %3561 }
 0x2c1   : > { %v971_v40 = vmul.f32 %v3562_v39, %v955_v19  ;;  %v986_v41 = vadd.f32 %v3158_v37, %v978_v38 }
 0x2c3   : > { %v979_v42 = vmul.f32 %v3157_v35, %v971_v40  ;;  %3301 = vmatprep.mubr.msk.f32.mxu1 %vm944_vm2, %v986_v41 }
 0x2c5   : > { %v987_v43 = vadd.f32 %v3158_v37, %v979_v42 }
 0x2c7   : > { %3302 = vmatmul.mubr.msk.f32.vlgmr.msra.gmra.mxu1 %vm944_vm2, %v987_v43 }
 0x2c8   : > { %3305 = vmatpush3.msra.mxu1 %v1093_v27 }
 0x2c9   : > { %3306 = vmatprep.subr.mxu1 %v1092_v44 }
 0x2ca   : > { %3307 = vmatpush3.msra.mxu1 %v1092_v44 }
 0x2cb   : > { %3308 = vmatprep.subr.mxu1 %v1091_v45 }
 0x2cc   : > { %3309 = vmatpush3.msra.mxu1 %v1091_v45 }
 0x2cd   : > { %3310 = vmatprep.subr.mxu1 %v1090_v46 }
 0x2ce   : > { %3311 = vmatpush3.msra.mxu1 %v1090_v46 }
 0x2cf   : > { %3312 = vmatprep.subr.mxu1 %v1089_v47 }
 0x2d0   : > { %3313 = vmatpush3.msra.mxu1 %v1089_v47 }
 0x2d1   : > { %3314 = vmatprep.subr.mxu1 %v1088_v48 }
 0x2d2   : > { %3315 = vmatpush3.msra.mxu1 %v1088_v48 }
 0x2d3   : > { %3316 = vmatprep.subr.mxu1 %v1087_v49 }
 0x2d4   : > { %3317 = vmatpush3.msra.mxu1 %v1087_v49 }
 0x2d5   : > { %3318 = vmatprep.subr.mxu1 %v1086_v50 }
 0x2d6   : > { %3319 = vmatpush3.msra.mxu1 %v1086_v50 }
 0x2d7   : > { %3320 = vmatprep.subr.mxu1 %v1085_v51 }
 0x2d8   : > { %3321 = vmatpush3.msra.mxu1 %v1085_v51 }
 0x2d9   : > { %3322 = vmatprep.subr.mxu1 %v1084_v52 }
 0x2da   : > { %3323 = vmatpush3.msra.mxu1 %v1084_v52 }
 0x2db   : > { %3324 = vmatprep.subr.mxu1 %v1083_v53 }
 0x2dc   : > { %3325 = vmatpush3.msra.mxu1 %v1083_v53 }
 0x2dd   : > { %3326 = vmatprep.subr.mxu1 %v1082_v54 }
 0x2de   : > { %3327 = vmatpush3.msra.mxu1 %v1082_v54 }
 0x2df   : > { %3356 = vmatprep.subr.mxu1 %v3845_v62 }
 0x387   : > { %v3303_v56 = vpop.f32.mrf.mxu1 }
 0x388   : > { %v1077_v57 = vadd.f32 %v3303_v56, %v3159_v55 }
 0x389   : > { %v1071_v58 = vpop.f32.mrf.mxu1 }
 0x38a   : > { %v1072_v59 = vadd.f32 %v3159_v55, %v1071_v58  ;;  %v1081_v61 = vmax.f32 %v1077_v57, 0.0 }
 0x38c   : > { %v1080_v60 = vmax.f32 %v1072_v59, 0.0 }
 0x38e   : > { %3328 = vmatprep.mubr.msk.f32.mxu1 %vm1101_vm3, %v1080_v60 }
 0x38f   : > { %3329 = vmatmul.mubr.msk.f32.vlgmr.msra.gmra.mxu1 %vm1101_vm3, %v1081_v61 }
 0x390   : > { %3358 = vmatprep.mubr.msk.f32.mxu1 %vm3846_vm4, %v3845_v62 }
 0x44f   : > { %v3330_v0 = vpop.f32.mrf.mxu1 }
 0x450   : > { %v1180_v1 = vadd.f32 %v3330_v0, %v3162_v63 }
 0x451   : > { %v1174_v2 = vpop.f32.mrf.mxu1 }
 0x452   : > { %1184 = vst.msk [vmem:[#allocation2 + $0x8] sm:$0xff] %vm1101_vm3, %v1180_v1  ;;  %v1175_v3 = vadd.f32 %v3162_v63, %v1174_v2 }
 0x454   : > { %1183 = vst.msk [vmem:[#allocation2] sm:$0xff] %vm1101_vm3, %v1175_v3 }
 0x459   : > { %v4342_v27 = vld [vmem:[#allocation2 + $0x8] sm:$0xff] }
 0x45b   : > { %v4308_v4 = vld [vmem:[#allocation2] sm:$0xff] }
 0x45c   : > { %1187 = vrot.lane.b32.xlu0 %v4308_v4, %s3847_s0 }
 0x460   : > { %1356 = vrot.lane.b32.xlu0 %v4308_v4, %s3848_s18 }
 0x4ce   : > { %v1188_v5 = vpop.permute.xlu0 %1187 }
 0x4cf   : > { %3332 = vmatpush3.xpose.msk.msra.mxu0 %vm1189_vm5, %v1188_v5 }
 0x4d0   : > { %3336 = vmatprep.subr.mxu0 %v3845_v62 }
 0x4d2   : > { %3334 = vmatmul.mubr.msk.f32.vlgmr.msra.gmra.mxu0 %vm1189_vm5, %v4308_v4  ;;  %v1357_v20 = vpop.permute.xlu0 %1356 }
 0x4d3   : > { %3338 = vmatprep.mubr.msk.f32.mxu0 %vm3846_vm4, %v3845_v62 }
 0x592   : > { %v1260_v6 = vpop.f32.mrf.mxu0 }
 0x593   : > { %v1264_v7 = vsel %vm1189_vm5, %v1260_v6, -inf }
 0x594   : > { %1265 = vmax.xlane.f32.xlu1 %v1264_v7  ;;  %v3335_v8 = vpop.f32.mrf.mxu0 }
 0x5a5   : > { %1275 = vrot.lane.b32.xlu1 %v4308_v4, %s3849_s20 }
 0x61d   : > { %v1266_v11 = vpop.xlane.xlu1 %1265 }
 0x61e   : > { %v1267_v12 = vsub.f32 %v1260_v6, %v1266_v11 }
 0x620   : > { %v1268_v13 = vmul.f32 1.442695, %v1267_v12 }
 0x621   : > { %v1276_v14 = vpop.permute.xlu1 %1275 }
 0x622   : > { %3563 = vpow2.f32 %v1268_v13  ;;  %3337 = vmatpush3.msra.mxu0 %v1276_v14 }
 0x623   : > { %3341 = vmatprep.subr.mxu0 %v3845_v62 }
 0x62f   : > { %v3564_v15 = vpop.eup %3563 }
 0x630   : > { %v1270_v16 = vsel %vm1189_vm5, %v3564_v15, 0.0 }
 0x631   : > { %1271 = vadd.xlane.f32.xlu1 %v1270_v16 }
 0x642   : > { %1354 = vrot.lane.b32.xlu1 %v4308_v4, %s3850_s15 }
 0x646   : > { %1529 = vrot.lane.b32.xlu1 %v4308_v4, %s3851_s1 }
 0x6ba   : > { %v1272_v17 = vpop.xlane.xlu1 %1271 }
 0x6bb   : > { %3565 = vrcp.f32 %v1272_v17 }
 0x6be   : > { %v1355_v21 = vpop.permute.xlu1 %1354 }
 0x6c2   : > { %v1530_v34 = vpop.permute.xlu1 %1529 }
 0x6c8   : > { %v3566_v18 = vpop.eup %3565 }
 0x6c9   : > { %v1274_v19 = vmul.f32 %v3566_v18, %v3564_v15 }
 0x6cb   : > { %3339 = vmatmul.mubr.msk.f32.vlgmr.msra.gmra.mxu0 %vm1189_vm5, %v1274_v19 }
 0x6cc   : > { %3342 = vmatpush3.xpose.msk.msra.mxu0 %vm1189_vm5, %v1357_v20  ;;  %3343 = vmatprep.mubr.msk.f32.mxu0 %vm3846_vm4, %v3845_v62 }
 0x6cd   : > { %3346 = vmatprep.subr.mxu0 %v3845_v62 }
 0x6cf   : > { %3344 = vmatmul.mubr.msk.f32.vlgmr.msra.gmra.mxu0 %vm1189_vm5, %v1355_v21 }
 0x6d0   : > { %3348 = vmatprep.mubr.msk.f32.mxu0 %vm3846_vm4, %v3845_v62 }
 0x78b   : > { %v1347_v22 = vpop.f32.mrf.mxu0 }
 0x78c   : > { %1351 = vst.msk [vmem:[#allocation3] sm:$0xff] %vm1189_vm5, %v1347_v22 }
 0x78d   : > { %v3340_v23 = vpop.f32.mrf.mxu0 }
 0x78f   : > { %v1428_v24 = vpop.f32.mrf.mxu0 }
 0x790   : > { %v1432_v25 = vsel %vm1189_vm5, %v1428_v24, -inf }
 0x791   : > { %1433 = vmax.xlane.f32.xlu0 %v1432_v25  ;;  %v3345_v26 = vpop.f32.mrf.mxu0 }
 0x7a7   : > { %1443 = vrot.lane.b32.xlu0 %v4308_v4, %s3852_s22 }
 0x7ab   : > { %1527 = vrot.lane.b32.xlu0 %v4308_v4, %s3853_s25 }
 0x7af   : > { %1700 = vrot.lane.b32.xlu0 %v4308_v4, %s3854_s26 }
 0x7b3   : > { %2041 = vrot.lane.b32.xlu0 %v4342_v27, %s3848_s18 }
 0x7b7   : > { %2213 = vrot.lane.b32.xlu0 %v4342_v27, %s3851_s1 }
 0x7bb   : > { %2385 = vrot.lane.b32.xlu0 %v4342_v27, %s3855_s14 }
 0x81a   : > { %v1434_v28 = vpop.xlane.xlu0 %1433 }
 0x81b   : > { %v1435_v29 = vsub.f32 %v1428_v24, %v1434_v28 }
 0x81d   : > { %v1436_v30 = vmul.f32 1.442695, %v1435_v29 }
 0x81e   : > { %v1444_v31 = vpop.permute.xlu0 %1443 }
 0x81f   : > { %3567 = vpow2.f32 %v1436_v30  ;;  %3347 = vmatpush3.msra.mxu0 %v1444_v31 }
 0x820   : > { %3351 = vmatprep.subr.mxu0 %v3845_v62 }
 0x822   : > { %v1528_v36 = vpop.permute.xlu0 %1527 }
 0x826   : > { %v1701_v40 = vpop.permute.xlu0 %1700 }
 0x82a   : > { %v2042_v42 = vpop.permute.xlu0 %2041 }
 0x82c   : > { %v3568_v32 = vpop.eup %3567 }
 0x82d   : > { %v1438_v33 = vsel %vm1189_vm5, %v3568_v32, 0.0 }
 0x82e   : > { %1439 = vadd.xlane.f32.xlu1 %v1438_v33  ;;  %v2214_v44 = vpop.permute.xlu0 %2213 }
 0x832   : > { %v2386_v46 = vpop.permute.xlu0 %2385 }
 0x83f   : > { %1702 = vrot.lane.b32.xlu1 %v4308_v4, %s3855_s14 }
 0x843   : > { %1873 = vrot.lane.b32.xlu1 %v4342_v27, %s3847_s0 }
 0x847   : > { %2039 = vrot.lane.b32.xlu1 %v4342_v27, %s3850_s15 }
 0x84b   : > { %2211 = vrot.lane.b32.xlu1 %v4342_v27, %s3853_s25 }
 0x84f   : > { %2383 = vrot.lane.b32.xlu1 %v4342_v27, %s3854_s26 }
 0x8b7   : > { %v1440_v35 = vpop.xlane.xlu1 %1439 }
 0x8b8   : > { %3569 = vrcp.f32 %v1440_v35 }
 0x8bb   : > { %v1703_v39 = vpop.permute.xlu1 %1702 }
 0x8bf   : > { %v1874_v41 = vpop.permute.xlu1 %1873 }
 0x8c3   : > { %v2040_v43 = vpop.permute.xlu1 %2039 }
 0x8c5   : > { %v3570_v37 = vpop.eup %3569 }
 0x8c6   : > { %v1442_v38 = vmul.f32 %v3570_v37, %v3568_v32 }
 0x8c7   : > { %v2212_v45 = vpop.permute.xlu1 %2211 }
 0x8c8   : > { %3349 = vmatmul.mubr.msk.f32.vlgmr.msra.gmra.mxu0 %vm1189_vm5, %v1442_v38 }
 0x8c9   : > { %3352 = vmatpush3.xpose.msk.msra.mxu0 %vm1189_vm5, %v1530_v34  ;;  %3353 = vmatprep.mubr.msk.f32.mxu0 %vm3846_vm4, %v3845_v62 }
 0x8ca   : > { %3361 = vmatprep.subr.mxu0 %v3845_v62 }
 0x8cb   : > { %v2384_v47 = vpop.permute.xlu1 %2383 }
 0x8cc   : > { %3354 = vmatmul.mubr.msk.f32.vlgmr.msra.gmra.mxu0 %vm1189_vm5, %v1528_v36 }
 0x8cd   : > { %3362 = vmatpush3.xpose.msk.msra.mxu0 %vm1189_vm5, %v1703_v39  ;;  %3363 = vmatprep.mubr.msk.f32.mxu0 %vm3846_vm4, %v3845_v62 }
 0x8ce   : > { %3371 = vmatprep.subr.mxu0 %v3845_v62 }
 0x8d0   : > { %3364 = vmatmul.mubr.msk.f32.vlgmr.msra.gmra.mxu0 %vm1189_vm5, %v1701_v40 }
 0x8d1   : > { %3372 = vmatpush3.xpose.msk.msra.mxu0 %vm1189_vm5, %v1874_v41  ;;  %3373 = vmatprep.mubr.msk.f32.mxu0 %vm3846_vm4, %v3845_v62 }
 0x8d2   : > { %3381 = vmatprep.subr.mxu0 %v3845_v62 }
 0x8d4   : > { %3374 = vmatmul.mubr.msk.f32.vlgmr.msra.gmra.mxu0 %vm1189_vm5, %v4342_v27 }
 0x8d5   : > { %3382 = vmatpush3.xpose.msk.msra.mxu0 %vm1189_vm5, %v2042_v42  ;;  %3383 = vmatprep.mubr.msk.f32.mxu0 %vm3846_vm4, %v3845_v62 }
 0x8d6   : > { %3391 = vmatprep.subr.mxu0 %v3845_v62 }
 0x8d8   : > { %3384 = vmatmul.mubr.msk.f32.vlgmr.msra.gmra.mxu0 %vm1189_vm5, %v2040_v43 }
 0x8d9   : > { %3392 = vmatpush3.xpose.msk.msra.mxu0 %vm1189_vm5, %v2214_v44  ;;  %3393 = vmatprep.mubr.msk.f32.mxu0 %vm3846_vm4, %v3845_v62 }
 0x8da   : > { %3401 = vmatprep.subr.mxu0 %v3845_v62 }
 0x8dc   : > { %3394 = vmatmul.mubr.msk.f32.vlgmr.msra.gmra.mxu0 %vm1189_vm5, %v2212_v45 }
 0x8dd   : > { %3402 = vmatpush3.xpose.msk.msra.mxu0 %vm1189_vm5, %v2386_v46  ;;  %3403 = vmatprep.mubr.msk.f32.mxu0 %vm3846_vm4, %v3845_v62 }
 0x8e0   : > { %3404 = vmatmul.mubr.msk.f32.vlgmr.msra.gmra.mxu0 %vm1189_vm5, %v2384_v47 }
 0x988   : > { %v4388_v48 = vpop.f32.mrf.mxu0 }
 0x98a   : > { %v3350_v49 = vpop.f32.mrf.mxu0 }
 0x98c   : > { %v1601_v50 = vpop.f32.mrf.mxu0 }
 0x98d   : > { %v1605_v51 = vsel %vm1189_vm5, %v1601_v50, -inf }
 0x98e   : > { %1606 = vmax.xlane.f32.xlu0 %v1605_v51  ;;  %v3355_v52 = vpop.f32.mrf.mxu0 }
 0x990   : > { %v1774_v53 = vpop.f32.mrf.mxu0 }
 0x991   : > { %v1778_v54 = vsel %vm1189_vm5, %v1774_v53, -inf }
 0x992   : > { %1779 = vmax.xlane.f32.xlu1 %v1778_v54  ;;  %v3365_v55 = vpop.f32.mrf.mxu0 }
 0x994   : > { %v1945_v56 = vpop.f32.mrf.mxu0 }
 0x995   : > { %v1949_v57 = vsel %vm1189_vm5, %v1945_v56, -inf }
 0x996   : > { %1950 = vmax.xlane.f32.xlu0 %v1949_v57  ;;  %v3375_v58 = vpop.f32.mrf.mxu0 }
 0x998   : > { %v2113_v59 = vpop.f32.mrf.mxu0 }
 0x999   : > { %v2117_v60 = vsel %vm1189_vm5, %v2113_v59, -inf }
 0x99a   : > { %2118 = vmax.xlane.f32.xlu0 %v2117_v60  ;;  %v3385_v61 = vpop.f32.mrf.mxu0 }
 0x99c   : > { %v2285_v63 = vpop.f32.mrf.mxu0 }
 0x99d   : > { %v2289_v0 = vsel %vm1189_vm5, %v2285_v63, -inf }
 0x99e   : > { %2290 = vmax.xlane.f32.xlu0 %v2289_v0  ;;  %v3395_v1 = vpop.f32.mrf.mxu0 }
 0x9a0   : > { %v2457_v2 = vpop.f32.mrf.mxu0 }
 0x9a1   : > { %v2461_v3 = vsel %vm1189_vm5, %v2457_v2, -inf }
 0x9a2   : > { %2462 = vmax.xlane.f32.xlu1 %v2461_v3  ;;  %v3405_v5 = vpop.f32.mrf.mxu0 }
 0x9a3   : > { %v2558_v5 = vld [vmem:[%s4186_s24 + $0x18] sm:$0xff] }
 0x9a4   : > { %3411 = vmatprep.subr.mxu0 %v2558_v5 }
 0x9a5   : > { %3412 = vmatpush3.msra.mxu0 %v2558_v5  ;;  %v2789_v5 = vld [vmem:[%s4244_s29 + $0x10] sm:$0xff] }
 0x9b3   : > { %1789 = vrot.lane.b32.xlu1 %v4308_v4, %s3856_s10 }
 0x9b7   : > { %1960 = vrot.lane.b32.xlu1 %v4342_v27, %s3849_s20 }
 0x9bb   : > { %2128 = vrot.lane.b32.xlu1 %v4342_v27, %s3852_s22 }
 0xa17   : > { %v1607_v6 = vpop.xlane.xlu0 %1606 }
 0xa18   : > { %v1608_v7 = vsub.f32 %v1601_v50, %v1607_v6  ;;  %v2557_v6 = vld [vmem:[%s4186_s24 + $0x10] sm:$0xff] }
 0xa19   : > { %3413 = vmatprep.subr.mxu0 %v2557_v6 }
 0xa1a   : > { %v1609_v8 = vmul.f32 1.442695, %v1608_v7  ;;  %v2556_v7 = vld [vmem:[%s4186_s24 + $0x8] sm:$0xff]  ;;  %3414 = vmatpush3.msra.mxu0 %v2557_v6 }
 0xa1b   : > { %v1780_v11 = vpop.xlane.xlu1 %1779  ;;  %3415 = vmatprep.subr.mxu0 %v2556_v7  ;;  %v2788_v6 = vld [vmem:[%s4244_s29 + $0x8] sm:$0xff] }
 0xa1c   : > { %3571 = vpow2.f32 %v1609_v8  ;;  %v1781_v12 = vsub.f32 %v1774_v53, %v1780_v11  ;;  %v2555_v11 = vld [vmem:[%s4186_s24] sm:$0xff]  ;;  %3416 = vmatpush3.msra.mxu0 %v2556_v7  ;;  %v3194_v7 = vld [vmem:[%s831_s17] ss:$0 sm:$0xff]  ;;  %s3861_s17 = smov [#allocation15]  }
 0xa1d   : > { %3417 = vmatprep.subr.mxu0 %v2555_v11  ;;  %s2896_s26 = sshll.u32 %s3861_s17, 4  ;;  %s2897_s26 = int_to_ptr.vmem [resolvable:$true] %s2896_s26 }
 0xa1e   : > { %v1782_v13 = vmul.f32 1.442695, %v1781_v12  ;;  %3418 = vmatpush3.msra.mxu0 %v2555_v11  ;;  %s3761_s21 = scalar_lea.vmem %s2897_s26, 256  ;;  %p3768_p7 = scmp.lt.s32.totalorder %s2897_s26, %s2897_s26 }
 0xa1f   : > { %v1951_v14 = vpop.xlane.xlu0 %1950  ;;  %p3762_p10 = scmp.ne.s32.totalorder %s2897_s26, %s3761_s21  ;;  %p3769_p11 = scmp.lt.s32.totalorder %s3761_s21, %s3761_s21 }
 0xa20   : > { %3573 = vpow2.f32 %v1782_v13  ;;  %v1952_v30 = vsub.f32 %v1945_v56, %v1951_v14 }
 0xa21   : > { %p3763_p12 = pnand %p3762_p10, %p3502_p8  ;;  %p3770_p2 = por %p3769_p11, %p3768_p7 }
 0xa22   : > { %v1953_v32 = vmul.f32 1.442695, %v1952_v30 }
 0xa23   : > { %v2119_v15 = vpop.xlane.xlu0 %2118  ;;  %p3764_p0 = pneg %p3763_p12 }
 0xa24   : > { %v2120_v16 = vsub.f32 %v2113_v59, %v2119_v15 }
 0xa25   : > { %p3771_p1 = pnand %p3770_p2, %p3764_p0 }
 0xa26   : > { %v2121_v17 = vmul.f32 1.442695, %v2120_v16 }
 0xa27   : > { %v2291_v31 = vpop.xlane.xlu0 %2290 }
 0xa28   : > { %3575 = vpow2.f32 %v2121_v17  ;;  %v2292_v33 = vsub.f32 %v2285_v63, %v2291_v31 }
 0xa29   : > { %v3572_v18 = vpop.eup %3571 }
 0xa2a   : > { %v1611_v19 = vsel %vm1189_vm5, %v3572_v18, 0.0  ;;  %v2293_v34 = vmul.f32 1.442695, %v2292_v33 }
 0xa2b   : > { %1612 = vadd.xlane.f32.xlu0 %v1611_v19  ;;  %v2463_v20 = vpop.xlane.xlu1 %2462 }
 0xa2c   : > { %v2464_v21 = vsub.f32 %v2457_v2, %v2463_v20 }
 0xa2d   : > { %v3574_v22 = vpop.eup %3573 }
 0xa2e   : > { %v2465_v23 = vmul.f32 1.442695, %v2464_v21  ;;  %v1784_v24 = vsel %vm1189_vm5, %v3574_v22, 0.0 }
 0xa2f   : > { %1785 = vadd.xlane.f32.xlu1 %v1784_v24  ;;  %v3189_v24 = vld [vmem:[%s4623_s11] ss:$0 sm:$0xff] }
 0xa30   : > { %3577 = vpow2.f32 %v2465_v23 }
 0xa31   : > { %3579 = vpow2.f32 %v1953_v32 }
 0xa32   : > { %3581 = vpow2.f32 %v2293_v34 }
 0xa35   : > { %v4404_v25 = vpop.eup %3575 }
 0xa36   : > { %v2123_v26 = vsel %vm1189_vm5, %v4404_v25, 0.0 }
 0xa37   : > { %2124 = vadd.xlane.f32.xlu1 %v2123_v26 }
 0xa3d   : > { %v4408_v28 = vpop.eup %3577 }
 0xa3e   : > { %v2467_v29 = vsel %vm1189_vm5, %v4408_v28, 0.0  ;;  %v3580_v35 = vpop.eup %3579 }
 0xa3f   : > { %2468 = vadd.xlane.f32.xlu1 %v2467_v29  ;;  %v1955_v36 = vsel %vm1189_vm5, %v3580_v35, 0.0  ;;  %v3582_v37 = vpop.eup %3581 }
 0xa40   : > { %v2295_v38 = vsel %vm1189_vm5, %v3582_v37, 0.0 }
 0xa41   : > { %1616 = vrot.lane.b32.xlu0 %v4308_v4, %s3857_s30  ;;  %v1790_v4 = vpop.permute.xlu1 %1789 }
 0xa45   : > { %v1961_v39 = vpop.permute.xlu1 %1960 }
 0xa49   : > { %v2129_v40 = vpop.permute.xlu1 %2128 }
 0xa50   : > { %2472 = vrot.lane.b32.xlu1 %v4342_v27, %s3856_s10 }
 0xa60   : > { %1956 = vadd.xlane.f32.xlu0 %v1955_v36 }
 0xa64   : > { %2296 = vadd.xlane.f32.xlu0 %v2295_v38 }
 0xa7a   : > { %2300 = vrot.lane.b32.xlu0 %v4342_v27, %s3857_s30 }
 0xa7e   : > { %1520 = vrot.lane.b32.xlu0 %v4388_v48, %s3858_s12 }
 0xab4   : > { %v1613_v41 = vpop.xlane.xlu0 %1612 }
 0xab5   : > { %3583 = vrcp.f32 %v1613_v41 }
 0xab8   : > { %v1617_v42 = vpop.permute.xlu0 %1616  ;;  %v1786_v43 = vpop.xlane.xlu1 %1785 }
 0xab9   : > { %3585 = vrcp.f32 %v1786_v43  ;;  %3357 = vmatpush3.msra.mxu1 %v1617_v42  ;;  %v2696_v43 = vld [vmem:[%s4188_s7 + $0x18] sm:$0xff] }
 0xaba   : > { %3366 = vmatprep.subr.mxu1 %v3845_v62 }
 0xac0   : > { %v2125_v47 = vpop.xlane.xlu1 %2124 }
 0xac2   : > { %v3584_v44 = vpop.eup %3583 }
 0xac3   : > { %v1615_v45 = vmul.f32 %v3584_v44, %v3572_v18  ;;  %v2695_v44 = vld [vmem:[%s4188_s7 + $0x10] sm:$0xff] }
 0xac5   : > { %3359 = vmatmul.mubr.msk.f32.vlgmr.msra.gmra.mxu1 %vm1189_vm5, %v1615_v45  ;;  %v2694_v45 = vld [vmem:[%s4188_s7 + $0x8] sm:$0xff] }
 0xac6   : > { %v3586_v27 = vpop.eup %3585  ;;  %3367 = vmatpush3.msra.mxu1 %v1790_v4  ;;  %3368 = vmatprep.mubr.msk.f32.mxu1 %vm3846_vm4, %v3845_v62 }
 0xac7   : > { %3376 = vmatprep.subr.mxu1 %v3845_v62  ;;  %v1788_v46 = vmul.f32 %v3586_v27, %v3574_v22  ;;  %v2693_v27 = vld [vmem:[%s4188_s7] sm:$0xff] }
 0xac8   : > { %v2469_v50 = vpop.xlane.xlu1 %2468 }
 0xac9   : > { %3369 = vmatmul.mubr.msk.f32.vlgmr.msra.gmra.mxu1 %vm1189_vm5, %v1788_v46  ;;  %v2794_v46 = vld [vmem:[%s4244_s29 + $0x38] sm:$0xff] }
 0xaca   : > { %3377 = vmatpush3.msra.mxu1 %v1961_v39  ;;  %3378 = vmatprep.mubr.msk.f32.mxu1 %vm3846_vm4, %v3845_v62 }
 0xacb   : > { %3386 = vmatprep.subr.mxu1 %v3845_v62  ;;  %3433 = vmatprep.subr.mxu0 %v2794_v46 }
 0xacc   : > { %v2473_v60 = vpop.permute.xlu1 %2472 }
 0xae9   : > { %v1957_v48 = vpop.xlane.xlu0 %1956 }
 0xaea   : > { %3587 = vrcp.f32 %v1957_v48  ;;  %v2792_v48 = vld [vmem:[%s4244_s29 + $0x28] sm:$0xff] }
 0xaeb   : > { %3589 = vrcp.f32 %v2125_v47  ;;  %v2793_v47 = vld [vmem:[%s4244_s29 + $0x30] sm:$0xff] }
 0xaed   : > { %v2297_v49 = vpop.xlane.xlu0 %2296 }
 0xaee   : > { %3591 = vrcp.f32 %v2297_v49  ;;  %v2791_v49 = vld [vmem:[%s4244_s29 + $0x20] sm:$0xff] }
 0xaef   : > { %3593 = vrcp.f32 %v2469_v50 }
 0xaf1   : > { %v2301_v51 = vpop.permute.xlu0 %2300 }
 0xaf5   : > { %v1521_v52 = vpop.permute.xlu0 %1520 }
 0xaf6   : > { %1524 = vst.msk [vmem:[#allocation3] sm:$0xff] %vm1523_vm6, %v1521_v52 }
 0xaf7   : > { %v3588_v53 = vpop.eup %3587 }
 0xaf8   : > { %v1959_v54 = vmul.f32 %v3588_v53, %v3580_v35  ;;  %v3590_v55 = vpop.eup %3589 }
 0xaf9   : > { %v2127_v56 = vmul.f32 %v3590_v55, %v4404_v25 }
 0xafa   : > { %3379 = vmatmul.mubr.msk.f32.vlgmr.msra.gmra.mxu1 %vm1189_vm5, %v1959_v54 }
 0xafb   : > { %3387 = vmatpush3.msra.mxu1 %v2129_v40  ;;  %3388 = vmatprep.mubr.msk.f32.mxu1 %vm3846_vm4, %v3845_v62  ;;  %v3592_v57 = vpop.eup %3591 }
 0xafc   : > { %3396 = vmatprep.subr.mxu1 %v3845_v62  ;;  %v2299_v58 = vmul.f32 %v3592_v57, %v3582_v37  ;;  %v3594_v59 = vpop.eup %3593  ;;  %v3192_v57 = vld [vmem:[%s825_s9] ss:$0 sm:$0xff] }
 0xafd   : > { %v2471_v61 = vmul.f32 %v3594_v59, %v4408_v28  ;;  %v3193_v59 = vld [vmem:[%s828_s13] ss:$0 sm:$0xff] }
 0xafe   : > { %3389 = vmatmul.mubr.msk.f32.vlgmr.msra.gmra.mxu1 %vm1189_vm5, %v2127_v56 }
 0xaff   : > { %3397 = vmatpush3.msra.mxu1 %v2301_v51  ;;  %3398 = vmatprep.mubr.msk.f32.mxu1 %vm3846_vm4, %v3845_v62 }
 0xb00   : > { %3406 = vmatprep.subr.mxu1 %v3845_v62 }
 0xb02   : > { %3399 = vmatmul.mubr.msk.f32.vlgmr.msra.gmra.mxu1 %vm1189_vm5, %v2299_v58 }
 0xb03   : > { %3407 = vmatpush3.msra.mxu1 %v2473_v60  ;;  %3408 = vmatprep.mubr.msk.f32.mxu1 %vm3846_vm4, %v3845_v62 }
 0xb04   : > { %3422 = vmatprep.subr.mxu1 %v2696_v43 }
 0xb06   : > { %3409 = vmatmul.mubr.msk.f32.vlgmr.msra.gmra.mxu1 %vm1189_vm5, %v2471_v61 }
 0xb07   : > { %3423 = vmatpush3.msra.mxu1 %v2696_v43 }
 0xb08   : > { %3424 = vmatprep.subr.mxu1 %v2695_v44 }
 0xb09   : > { %3425 = vmatpush3.msra.mxu1 %v2695_v44 }
 0xb0a   : > { %3426 = vmatprep.subr.mxu1 %v2694_v45 }
 0xb0b   : > { %3427 = vmatpush3.msra.mxu1 %v2694_v45 }
 0xb0c   : > { %3428 = vmatprep.subr.mxu1 %v2693_v27 }
 0xb0d   : > { %3429 = vmatpush3.msra.mxu1 %v2693_v27 }
 0xb85   : > { %v1688_v63 = vpop.f32.mrf.mxu1 }
 0xb86   : > { %1693 = vrot.lane.b32.xlu1 %v1688_v63, %s3859_s27 }
 0xb87   : > { %v3360_v0 = vpop.f32.mrf.mxu1 }
 0xb89   : > { %v1861_v1 = vpop.f32.mrf.mxu1 }
 0xb8a   : > { %1866 = vrot.lane.b32.xlu1 %v1861_v1, %s3860_s16 }
 0xb8b   : > { %v3370_v2 = vpop.f32.mrf.mxu1 }
 0xbba   : > { %v2032_v3 = vpop.f32.mrf.mxu1 }
 0xbbb   : > { %2036 = vst.msk [vmem:[#allocation3 + $0x8] sm:$0xff] %vm1189_vm5, %v2032_v3  ;;  %v2790_v3 = vld [vmem:[%s4244_s29 + $0x18] sm:$0xff] }
 0xbbc   : > { %v3380_v62 = vpop.f32.mrf.mxu1 }
 0xbbd   : > { %v2787_v62 = vld [vmem:[%s4244_s29] sm:$0xff] }
 0xbbe   : > { %v2200_v8 = vpop.f32.mrf.mxu1 }
 0xbbf   : > { %2205 = vrot.lane.b32.xlu0 %v2200_v8, %s3858_s12 }
 0xbc0   : > { %v3390_v12 = vpop.f32.mrf.mxu1 }
 0xbc2   : > { %v2372_v13 = vpop.f32.mrf.mxu1 }
 0xbc3   : > { %2377 = vrot.lane.b32.xlu0 %v2372_v13, %s3859_s27 }
 0xbc4   : > { %v3400_v14 = vpop.f32.mrf.mxu1 }
 0xbc6   : > { %v2544_v15 = vpop.f32.mrf.mxu1 }
 0xbc7   : > { %2549 = vrot.lane.b32.xlu1 %v2544_v15, %s3860_s16 }
 0xbc8   : > { %v3410_v16 = vpop.f32.mrf.mxu1 }
 0xbc9   : > { %v3197_v16 = vld [vmem:[%s839_s23] ss:$0 sm:$0xff] }
 0xbf8   : > { %v1694_v17 = vpop.permute.xlu1 %1693 }
 0xbf9   : > { %1697 = vst.msk [vmem:[#allocation3] sm:$0xff] %vm1696_vm7, %v1694_v17 }
 0xbfc   : > { %v1867_v18 = vpop.permute.xlu1 %1866 }
 0xbfd   : > { %1870 = vst.msk [vmem:[#allocation3] sm:$0xff] %vm1869_vm8, %v1867_v18 }
 0xc04   : > { %v2553_v19 = vld [vmem:[#allocation3] sm:$0xff] }
 0xc05   : > { %3419 = vmatprep.mubr.msk.f32.mxu0 %vm944_vm2, %v2553_v19 }
 0xc31   : > { %v2206_v20 = vpop.permute.xlu0 %2205 }
 0xc32   : > { %2208 = vst.msk [vmem:[#allocation3 + $0x8] sm:$0xff] %vm1523_vm6, %v2206_v20 }
 0xc35   : > { %v2378_v21 = vpop.permute.xlu0 %2377 }
 0xc36   : > { %2380 = vst.msk [vmem:[#allocation3 + $0x8] sm:$0xff] %vm1696_vm7, %v2378_v21 }
 0xc39   : > { %v2550_v22 = vpop.permute.xlu1 %2549 }
 0xc3a   : > { %2552 = vst.msk [vmem:[#allocation3 + $0x8] sm:$0xff] %vm1869_vm8, %v2550_v22 }
 0xc41   : > { %v2554_v23 = vld [vmem:[#allocation3 + $0x8] sm:$0xff] }
 0xc42   : > { %3420 = vmatmul.mubr.msk.f32.vlgmr.msra.gmra.mxu0 %vm944_vm2, %v2554_v23 }
 0xc43   : > { %3434 = vmatpush3.msra.mxu0 %v2794_v46 }
 0xc44   : > { %3435 = vmatprep.subr.mxu0 %v2793_v47 }
 0xc45   : > { %3436 = vmatpush3.msra.mxu0 %v2793_v47 }
 0xc46   : > { %3437 = vmatprep.subr.mxu0 %v2792_v48 }
 0xc47   : > { %3438 = vmatpush3.msra.mxu0 %v2792_v48 }
 0xc48   : > { %3439 = vmatprep.subr.mxu0 %v2791_v49 }
 0xc49   : > { %3440 = vmatpush3.msra.mxu0 %v2791_v49 }
 0xc4a   : > { %3441 = vmatprep.subr.mxu0 %v2790_v3 }
 0xc4b   : > { %3442 = vmatpush3.msra.mxu0 %v2790_v3 }
 0xc4c   : > { %3443 = vmatprep.subr.mxu0 %v2789_v5 }
 0xc4d   : > { %3444 = vmatpush3.msra.mxu0 %v2789_v5 }
 0xc4e   : > { %3445 = vmatprep.subr.mxu0 %v2788_v6 }
 0xc4f   : > { %3446 = vmatpush3.msra.mxu0 %v2788_v6 }
 0xc50   : > { %3447 = vmatprep.subr.mxu0 %v2787_v62 }
 0xc51   : > { %3448 = vmatpush3.msra.mxu0 %v2787_v62 }
 0xd02   : > { %v3421_v25 = vpop.f32.mrf.mxu0 }
 0xd03   : > { %v2644_v26 = vadd.f32 %v3421_v25, %v3189_v24 }
 0xd04   : > { %v2638_v28 = vpop.f32.mrf.mxu0 }
 0xd05   : > { %v4459_v29 = vadd.f32 %v2644_v26, %v4250_v10  ;;  %v2639_v30 = vadd.f32 %v3189_v24, %v2638_v28 }
 0xd07   : > { %v4462_v31 = vadd.f32 %v2639_v30, %v4248_v9  ;;  %v2654_v32 = vsel %vm944_vm2, %v4459_v29, 0.0 }
 0xd08   : > { %2655 = vadd.xlane.f32.xlu1 %v2654_v32 }
 0xd09   : > { %v2651_v33 = vsel %vm944_vm2, %v4462_v31, 0.0 }
 0xd0a   : > { %2652 = vadd.xlane.f32.xlu0 %v2651_v33 }
 0xd91   : > { %v2656_v34 = vpop.xlane.xlu1 %2655 }
 0xd92   : > { %v2658_v35 = vmul.f32 0.03125, %v2656_v34 }
 0xd93   : > { %v2653_v36 = vpop.xlane.xlu0 %2652 }
 0xd94   : > { %v2657_v37 = vmul.f32 0.03125, %v2653_v36  ;;  %v2660_v38 = vsub.f32 %v4459_v29, %v2658_v35 }
 0xd96   : > { %v2659_v4 = vsub.f32 %v4462_v31, %v2657_v37  ;;  %v2662_v41 = vmul.f32 %v2660_v38, %v2660_v38 }
 0xd98   : > { %v2661_v39 = vmul.f32 %v2659_v4, %v2659_v4  ;;  %v2666_v42 = vsel %vm944_vm2, %v2662_v41, 0.0 }
 0xd9a   : > { %v2663_v40 = vsel %vm944_vm2, %v2661_v39, 0.0 }
 0xd9b   : > { %2664 = vadd.xlane.f32.xlu0 %v2663_v40 }
 0xd9f   : > { %2667 = vadd.xlane.f32.xlu0 %v2666_v42 }
 0xe24   : > { %v2665_v50 = vpop.xlane.xlu0 %2664 }
 0xe25   : > { %v2669_v51 = vmul.f32 0.03125, %v2665_v50 }
 0xe27   : > { %v2671_v52 = vadd.f32 1e-05, %v2669_v51 }
 0xe28   : > { %v2668_v53 = vpop.xlane.xlu0 %2667 }
 0xe29   : > { %3595 = vrsqrt.f32 %v2671_v52  ;;  %v2670_v54 = vmul.f32 0.03125, %v2668_v53 }
 0xe2b   : > { %v2672_v55 = vadd.f32 1e-05, %v2670_v54 }
 0xe2d   : > { %3597 = vrsqrt.f32 %v2672_v55 }
 0xe36   : > { %v3596_v56 = vpop.eup %3595 }
 0xe37   : > { %v2675_v58 = vmul.f32 %v3596_v56, %v2659_v4 }
 0xe39   : > { %v2683_v60 = vmul.f32 %v3192_v57, %v2675_v58 }
 0xe3a   : > { %v3598_v61 = vpop.eup %3597 }
 0xe3b   : > { %v2676_v63 = vmul.f32 %v3598_v61, %v2660_v38  ;;  %v2691_v0 = vadd.f32 %v3193_v59, %v2683_v60 }
 0xe3d   : > { %v2684_v1 = vmul.f32 %v3192_v57, %v2676_v63  ;;  %3430 = vmatprep.mubr.msk.f32.mxu1 %vm944_vm2, %v2691_v0 }
 0xe3f   : > { %v2692_v2 = vadd.f32 %v3193_v59, %v2684_v1 }
 0xe41   : > { %3431 = vmatmul.mubr.msk.f32.vlgmr.msra.gmra.mxu1 %vm944_vm2, %v2692_v2 }
 0xf01   : > { %v3432_v8 = vpop.f32.mrf.mxu1 }
 0xf02   : > { %v2782_v11 = vadd.f32 %v3432_v8, %v3194_v7 }
 0xf03   : > { %v2776_v12 = vpop.f32.mrf.mxu1 }
 0xf04   : > { %v2777_v13 = vadd.f32 %v3194_v7, %v2776_v12  ;;  %v2786_v15 = vmax.f32 %v2782_v11, 0.0 }
 0xf06   : > { %v2785_v14 = vmax.f32 %v2777_v13, 0.0 }
 0xf08   : > { %3449 = vmatprep.mubr.msk.f32.mxu0 %vm2802_vm9, %v2785_v14 }
 0xf09   : > { %3450 = vmatmul.mubr.msk.f32.vlgmr.msra.gmra.mxu0 %vm2802_vm9, %v2786_v15 }
 0xfc9   : > { %v3451_v17 = vpop.f32.mrf.mxu0 }
 0xfca   : > { %v2881_v18 = vadd.f32 %v3451_v17, %v3197_v16 }
 0xfcb   : > { %v2875_v19 = vpop.f32.mrf.mxu0 }
 0xfcc   : > { %v2885_v20 = vadd.f32 %v2881_v18, %v4459_v29  ;;  %v2876_v21 = vadd.f32 %v3197_v16, %v2875_v19 }
 0xfce   : > { %v2887_v22 = vadd.f32 %v2885_v20, %v4250_v10  ;;  %v2884_v23 = vadd.f32 %v2876_v21, %v4462_v31 }
 0xfd0   : > { %2889 = vst.msk [vmem:[#allocation15 + $0x8] sm:$0xff] %vm944_vm2, %v2887_v22  ;;  %v2886_v24 = vadd.f32 %v2884_v23, %v4248_v9 }
 0xfd2   : > { %2888 = vst.msk [vmem:[#allocation15] sm:$0xff] %vm944_vm2, %v2886_v24 }
 0xfd3   : > { %3774 = shalt.err (!%p3771_p1)
}
 0xfd4   : > { %s3862_s23 = smov 128   ;;  %s4628_s30 = sld [smem:[#allocation38_spill]] }
 0xfda   : > { %3472 = dma.vmem_to_hbm [thread:$0]  (%p3502_p8), %s2897_s26, 256, %s4628_s30, [#allocation6], %s3862_s23, %s3862_s23, %s3858_s12  }
 0xfdb   : > { %3818 = dma.done.wait (%p3502_p8), [#allocation6], 256  }
 0xfdc   : > { %3820 = vsyncadd (%p3502_p8), [#allocation6], 4294967040 }
 0xfdd PF: > { %s4629_s27 = sld [smem:[#allocation23_spill]] }
 0xfde   : > { %s4630_s24 = sld [smem:[#allocation21_spill]] }
 0xfdf   : > { %s4631_s25 = sld [smem:[#allocation22_spill]] }
 0xfe0   : > { %s4632_s26 = sld [smem:[#allocation24_spill]] }
 0xfe3   : > { %p33_p4 = scmp.ge.s32.totalorder %s4629_s27, 5  }
 0xfe5   :  { %35 = sbr.rel (!%p33_p4) target bundleno = 23 (0x17), region = 199 }
 0xfea   :  { %2912 = vsyncpa [#allocation5], 1 }
 0xfeb   :  { %2914 = vsyncpa [#allocation5 + $0x1], 1 }
 0xfec   :  { %2915 = vsyncpa [#allocation8], 1 }
 0xfed   :  { %2916 = vsyncpa [#allocation11], 1 }
 0xfee   :  { %2918 = vsyncpa [#allocation11 + $0x1], 1 }
 0xfef   :  { %2919 = vsyncpa [#allocation14], 1 }
 0xff0   :  { %2921 = vsyncpa [#allocation14 + $0x1], 1 }
 0xff1   :  { %2922 = vsyncpa [#allocation6], 1 }
 0xff2   :  { %2924 = vsyncpa [#allocation6 + $0x1], 1 }

</bundles_post_ra>
